<compile_context>
chip_gen: v7x
topology: tpu7x:2x2x1
jax: 0.10.0
libtpu: 0.0.40
codegen_flags: <defaults>
</compile_context>

<pallas_src>
import numpy as np
import jax
import jax.numpy as jnp
from jax import lax
from jax.experimental import pallas as pl
from jax.experimental.pallas import tpu as pltpu

NEG_SLOPE = 0.01  # nn.LeakyReLU default negative_slope


def _leaky(x):
    # leaky_relu(x) == max(x, 0.01 * x) for slope < 1 (f32 on all chips)
    return jnp.maximum(x, NEG_SLOPE * x)


# --------------------------------------------------------------------------- #
# Kernel
# --------------------------------------------------------------------------- #
def relational_kernel(xp_ref, erb_ref, w1_ref, w2_ref, b2_ref,
                      w3_ref, b3_ref, w4_ref, b4_ref, out_ref):
    """One grid step == TP batch-element PAIRS (2*TP batch elements).

    xp_ref  : (TP, 2L+1, 2*(2c1+1))  host-packed block-structured features,
              pair p cols 0:2c1+1 -> element 2p, cols 2c1+1: -> element 2p+1
    erb_ref : (L*L, 2L+1)            constant [E | R | 1] (bias folded)
    w1_ref  : (2*(2c1+1), 128)       pair-packed [W1_i; W1_j; b1] block-diag
    w2_ref  : (128, 128)             g_fcc_1 weight, block-diag for 2 elements
    w3_ref  : (128, 128)             post_processing weight, block-diag
    w4_ref  : (128, 2U)              output layer weight, block-diag
    b2/3/4  : (1, 128) / (1, 128) / (1, 2U)  lane-packed biases (f32)
    out_ref : (2*TP, U)
    """
    erb = erb_ref[...]
    w1 = w1_ref[...]
    w2 = w2_ref[...]
    b2 = b2_ref[...]
    w3 = w3_ref[...]
    b3 = b3_ref[...]
    w4 = w4_ref[...]
    b4 = b4_ref[...]
    cdt = erb.dtype                       # matmul compute dtype (f32 or bf16)
    n_pairs = xp_ref.shape[0]
    out_units = out_ref.shape[-1]

    def pair_body(p, carry):
        xp = xp_ref[p]                                               # (2L+1, 22)
        # g_fcc_0 for both elements of the pair, already stacked as
        # rows [x@W1i ; x@W1j ; b1] in lanes 0:64 / 64:128 -> one matmul.
        m = jnp.dot(xp, w1, preferred_element_type=jnp.float32)     # (2L+1, 128)
        # expand to all L*L location pairs (bias folded via the ones column)
        h1 = _leaky(jnp.dot(erb, m.astype(cdt),
                            preferred_element_type=jnp.float32))    # (L*L, 128)
        # g_fcc_1 (block-diag weight -> both elements in one pass)
        h2 = _leaky(jnp.dot(h1.astype(cdt), w2,
                            preferred_element_type=jnp.float32) + b2)
        # sum over all L*L location pairs (VPU/XLU; keeps the MXU free)
        s = jnp.sum(h2, axis=0, keepdims=True)                       # (1, 128)
        # f-network, still lane-packed per pair
        f = _leaky(jnp.dot(s.astype(cdt), w3,
                           preferred_element_type=jnp.float32) + b3)  # (1, 128)
        o = _leaky(jnp.dot(f.astype(cdt), w4,
                           preferred_element_type=jnp.float32) + b4)  # (1, 2U)
        out_ref[pl.ds(2 * p, 1), :] = o[:, :out_units]
        out_ref[pl.ds(2 * p + 1, 1), :] = o[:, out_units:]
        return carry

    lax.fori_loop(0, n_pairs, pair_body, 0)


# --------------------------------------------------------------------------- #
# Host-side preparation (pure XLA glue, tiny)
# --------------------------------------------------------------------------- #
def _adaptive_pool_matrix(in_size, out_size):
    """Matrix P (out,in) s.t. P @ v reproduces torch adaptive_avg_pool1d."""
    P = np.zeros((out_size, in_size), np.float32)
    for i in range(out_size):
        start = (i * in_size) // out_size
        end = -((-(i + 1) * in_size) // out_size)  # ceil
        P[i, start:end] = 1.0 / (end - start)
    return jnp.asarray(P)


def _build_features(x_img):
    """NCHW -> (B, L, c+1): adaptive pool, permute, coordinate concat."""
    b, c, h, w = x_img.shape
    # Matches the torch module: pooling (of BOTH dims to 5) is gated on h > 5.
    if h > 5:
        Ph = _adaptive_pool_matrix(h, 5)
        Pw = _adaptive_pool_matrix(w, 5)
        x_img = jnp.einsum('oh,bchw,pw->bcop', Ph, x_img, Pw)
    b, c, h, w = x_img.shape
    L = h * w
    out_img = x_img.reshape(b, c, L).transpose(0, 2, 1)              # (b, L, c)
    coords = jnp.broadcast_to(
        jnp.arange(L, dtype=jnp.float32).reshape(1, L, 1), (b, L, 1))
    out_img = jnp.concatenate([out_img, coords], axis=2)             # (b, L, c+1)
    return out_img, L, c + 1


def _pack_features(feats, L, c1):
    """(Bp, L, c1) -> (Bp//2, 2L+1, 2*(2c1+1)) block-structured pair slabs.

    Per element the slab rows are [x|0|0] (x_i half), [0|x|0] (x_j half),
    [0|0|1] (bias selector); two elements are packed along the last axis so a
    single matmul against the pair-packed first-layer weight yields
    [x@W1i; x@W1j; b1] for both elements in lanes 0:64 / 64:128.
    """
    Bp = feats.shape[0]
    d = 2 * c1 + 1
    z = jnp.zeros_like(feats)
    xi = jnp.concatenate([feats, z], axis=2)                  # rows 0:L
    xj = jnp.concatenate([z, feats], axis=2)                  # rows L:2L
    xs = jnp.concatenate([xi, xj], axis=1)                    # (Bp, 2L, 2c1)
    xs = jnp.concatenate(
        [xs, jnp.zeros((Bp, 2 * L, 1), feats.dtype)], axis=2)  # (Bp, 2L, d)
    bias_row = jnp.zeros((Bp, 1, d), feats.dtype).at[:, :, 2 * c1].set(1.0)
    xs = jnp.concatenate([xs, bias_row], axis=1)               # (Bp, 2L+1, d)
    xs = xs.reshape(Bp // 2, 2, 2 * L + 1, d)
    xs = xs.transpose(0, 2, 1, 3).reshape(Bp // 2, 2 * L + 1, 2 * d)
    return xs


def _pack_params(params, L, c1, cdt):
    """Build kernel-ready constants: [E|R|1], pair-packed / block-diag weights."""
    w1, b1, w2, b2, w3, b3, w4, b4 = [np.asarray(p, np.float32) for p in params]
    out_units = w4.shape[0]

    # [E | R | 1]: row k selects x_i = location k % L, x_j = location k // L,
    # plus a ones column that folds in the g_fcc_0 bias.
    k = np.arange(L * L)
    loc = np.arange(L)
    erb = np.concatenate(
        [(k[:, None] % L == loc[None, :]).astype(np.float32),
         (k[:, None] // L == loc[None, :]).astype(np.float32),
         np.ones((L * L, 1), np.float32)], axis=1)             # (L*L, 2L+1)

    def blockdiag(a):                                          # [[a, 0], [0, a]]
        z = np.zeros_like(a)
        return np.block([[a, z], [z, a]])

    # first g-layer stacked as [W1_i; W1_j; b1], then pair-packed block-diag
    w_stack = np.concatenate([w1.T, b1[None, :]], axis=0)      # (2c1+1, 64)
    w1p = blockdiag(w_stack)                                   # (2*(2c1+1), 128)
    w2bd = blockdiag(w2.T)                                     # (128, 128)
    w3bd = blockdiag(w3.T)                                     # (128, 128)
    w4bd = blockdiag(w4.T)                                     # (128, 2U)
    b2p = np.tile(b2, 2)[None]                                 # (1, 128)
    b3p = np.tile(b3, 2)[None]
    b4p = np.tile(b4, 2)[None]                                 # (1, 2U)

    to_c = lambda a: jnp.asarray(a, cdt)
    to_f = lambda a: jnp.asarray(a, jnp.float32)
    return (to_c(erb), to_c(w1p), to_c(w2bd), to_f(b2p),
            to_c(w3bd), to_f(b3p), to_c(w4bd), to_f(b4p), out_units)


def _choose_block(B, batch_block):
    """Pick (TB, B_pad): TB even (pair packing); TB % 8 == 0 or TB == B_pad
    (output tiling rule); >=2 grid steps when the batch allows (v7x megacore);
    avoid padded garbage batch rows where possible."""
    B_even = B + (B & 1)
    batch_block = max(2, batch_block)
    if B_even % 8 == 0 and B_even >= 16:
        cap = max(8, (min(batch_block, B_even // 2) // 8) * 8)
        tb = 8
        for cand in range(cap, 7, -8):
            if B_even % cand == 0:
                tb = cand
                break
        return tb, B_even                       # multiple of 8, >=2 steps, no pad
    if B_even <= batch_block:
        return B_even, B_even                   # single resident block, no pad
    tb = max(8, (batch_block // 8) * 8)
    return tb, -(-B_even // tb) * tb


# --------------------------------------------------------------------------- #
# Public forward
# --------------------------------------------------------------------------- #
def meta_batch_relational_forward(x_img, params, *, batch_block=32,
                                  use_bf16=False):
    """Forward pass of MetaBatchRelationalModule (use_coordinates=True)."""
    cdt = jnp.bfloat16 if use_bf16 else jnp.float32

    feats, L, c1 = _build_features(x_img)                      # (B, L, c1) f32
    B = feats.shape[0]
    TB, B_pad = _choose_block(B, batch_block)
    if B_pad != B:
        feats = jnp.pad(feats, ((0, B_pad - B), (0, 0), (0, 0)))

    xp = _pack_features(feats, L, c1).astype(cdt)              # (B_pad//2, 2L+1, 22)
    (erb, w1p, w2bd, b2p, w3bd, b3p, w4bd, b4p,
     out_units) = _pack_params(params, L, c1, cdt)

    TP = TB // 2
    n_blocks = B_pad // TB
    kk = 2 * L + 1
    d2 = 2 * (2 * c1 + 1)

    out = pl.pallas_call(
        relational_kernel,
        out_shape=jax.ShapeDtypeStruct((B_pad, out_units), jnp.float32),
        grid_spec=pltpu.PrefetchScalarGridSpec(
            num_scalar_prefetch=0,
            grid=(n_blocks,),
            in_specs=[
                pl.BlockSpec((TP, kk, d2), lambda i: (i, 0, 0)),   # pair features
                pl.BlockSpec((L * L, kk), lambda i: (0, 0)),       # [E|R|1]
                pl.BlockSpec((d2, 128), lambda i: (0, 0)),         # g_fcc_0 (+b1)
                pl.BlockSpec((128, 128), lambda i: (0, 0)),        # g_fcc_1
                pl.BlockSpec((1, 128), lambda i: (0, 0)),          # b2 packed
                pl.BlockSpec((128, 128), lambda i: (0, 0)),        # post_processing
                pl.BlockSpec((1, 128), lambda i: (0, 0)),          # b3 packed
                pl.BlockSpec((128, 2 * out_units), lambda i: (0, 0)),  # output layer
                pl.BlockSpec((1, 2 * out_units), lambda i: (0, 0)),    # b4 packed
            ],
            out_specs=pl.BlockSpec((TB, out_units), lambda i: (i, 0)),
        ),
        compiler_params=pltpu.CompilerParams(
            # batch blocks are fully independent -> shard across TCs on v7x
            dimension_semantics=("parallel",)),
    )(xp, erb, w1p, w2bd, b2p, w3bd, b3p, w4bd, b4p)
    return out[:B]


# --------------------------------------------------------------------------- #
# Parameter init + pure-JAX reference (validation)
# --------------------------------------------------------------------------- #
def init_params(key, c_plus_coord, output_units=32):
    """Deterministic xavier_uniform weights / zero biases (matches __init__)."""
    fin = 2 * c_plus_coord

    def xavier(k, out_f, in_f):
        bound = float(np.sqrt(6.0 / (in_f + out_f)))
        return jax.random.uniform(k, (out_f, in_f), jnp.float32, -bound, bound)

    k1, k2, k3, k4 = jax.random.split(key, 4)
    w1 = xavier(k1, 64, fin);          b1 = jnp.zeros((64,), jnp.float32)
    w2 = xavier(k2, 64, 64);           b2 = jnp.zeros((64,), jnp.float32)
    w3 = xavier(k3, 64, 64);           b3 = jnp.zeros((64,), jnp.float32)
    w4 = xavier(k4, output_units, 64); b4 = jnp.zeros((output_units,), jnp.float32)
    return (w1, b1, w2, b2, w3, b3, w4, b4)


def _reference_forward(x_img, params):
    """Pure-JAX reference replicating the PyTorch forward, for validation."""
    w1, b1, w2, b2, w3, b3, w4, b4 = params
    out_img, L, c1 = _build_features(x_img)
    b = out_img.shape[0]
    x_i = jnp.broadcast_to(out_img[:, None, :, :], (b, L, L, c1))
    x_j = jnp.broadcast_to(out_img[:, :, None, :], (b, L, L, c1))
    pair = jnp.concatenate([x_i, x_j], axis=3).reshape(b * L * L, 2 * c1)
    h = _leaky(pair @ w1.T + b1)
    h = _leaky(h @ w2.T + b2)
    s = h.reshape(b, L, L, 64).sum(1).sum(1)
    f = _leaky(s @ w3.T + b3)
    o = _leaky(f @ w4.T + b4)
    return o


if __name__ == "__main__":
    key = jax.random.PRNGKey(0)
    kx, kp = jax.random.split(key)

    # small shapes consistent with the module: NCHW input, h>5 so it pools to 5x5
    B, C, H, W = 2, 4, 16, 16
    x = jax.random.normal(kx, (B, C, H, W), jnp.float32)
    params = init_params(kp, c_plus_coord=C + 1, output_units=32)

    ref = _reference_forward(x, params)

    # f32 path (exact semantics of the PyTorch module)
    out = jax.block_until_ready(meta_batch_relational_forward(x, params))
    assert out.shape == (B, 32), out.shape
    np.testing.assert_allclose(np.asarray(out), np.asarray(ref),
                               rtol=1e-4, atol=1e-3)

    # bf16-MXU fast path (f32 accumulate) — looser tolerance per quantization
    out_bf16 = jax.block_until_ready(
        meta_batch_relational_forward(x, params, use_bf16=True))
    np.testing.assert_allclose(np.asarray(out_bf16), np.asarray(ref),
                               rtol=8e-2, atol=1.0)

    print("KERNEL_OK")
</pallas_src>

<mosaic_0001>
module attributes {stable_mosaic.version = 11 : i64} {
  func.func @relational_kernel(%arg0: i32, %arg1: memref<1x51x22xf32, #tpu.memory_space<vmem>>, %arg2: memref<625x51xf32, #tpu.memory_space<vmem>>, %arg3: memref<22x128xf32, #tpu.memory_space<vmem>>, %arg4: memref<128x128xf32, #tpu.memory_space<vmem>>, %arg5: memref<1x128xf32, #tpu.memory_space<vmem>>, %arg6: memref<128x128xf32, #tpu.memory_space<vmem>>, %arg7: memref<1x128xf32, #tpu.memory_space<vmem>>, %arg8: memref<128x64xf32, #tpu.memory_space<vmem>>, %arg9: memref<1x64xf32, #tpu.memory_space<vmem>>, %arg10: memref<2x32xf32, #tpu.memory_space<vmem>>) attributes {dimension_semantics = [#tpu.dimension_semantics<parallel>], iteration_bounds = array<i64: 1>, scalar_prefetch = 0 : i64, scratch_operands = 0 : i64, tpu.core_type = #tpu.core_type<tc>, window_params = [{transform_indices = @transform_0, window_bounds = array<i64: 1, 51, 22>}, {pipeline_mode = #tpu.pipeline_mode<synchronous>, transform_indices = @transform_1, window_bounds = array<i64: 625, 51>}, {pipeline_mode = #tpu.pipeline_mode<synchronous>, transform_indices = @transform_2, window_bounds = array<i64: 22, 128>}, {pipeline_mode = #tpu.pipeline_mode<synchronous>, transform_indices = @transform_3, window_bounds = array<i64: 128, 128>}, {pipeline_mode = #tpu.pipeline_mode<synchronous>, transform_indices = @transform_4, window_bounds = array<i64: 1, 128>}, {pipeline_mode = #tpu.pipeline_mode<synchronous>, transform_indices = @transform_5, window_bounds = array<i64: 128, 128>}, {pipeline_mode = #tpu.pipeline_mode<synchronous>, transform_indices = @transform_6, window_bounds = array<i64: 1, 128>}, {pipeline_mode = #tpu.pipeline_mode<synchronous>, transform_indices = @transform_7, window_bounds = array<i64: 128, 64>}, {pipeline_mode = #tpu.pipeline_mode<synchronous>, transform_indices = @transform_8, window_bounds = array<i64: 1, 64>}, {transform_indices = @transform_9, window_bounds = array<i64: 2, 32>}]} {
    %c0 = arith.constant 0 : index
    %c0_0 = arith.constant 0 : index
    %0 = vector.load %arg2[%c0, %c0_0] : memref<625x51xf32, #tpu.memory_space<vmem>>, vector<625x51xf32>
    %c0_1 = arith.constant 0 : index
    %c0_2 = arith.constant 0 : index
    %1 = vector.load %arg3[%c0_1, %c0_2] : memref<22x128xf32, #tpu.memory_space<vmem>>, vector<22x128xf32>
    %c0_3 = arith.constant 0 : index
    %c0_4 = arith.constant 0 : index
    %2 = vector.load %arg4[%c0_3, %c0_4] : memref<128x128xf32, #tpu.memory_space<vmem>>, vector<128x128xf32>
    %c0_5 = arith.constant 0 : index
    %c0_6 = arith.constant 0 : index
    %3 = vector.load %arg5[%c0_5, %c0_6] : memref<1x128xf32, #tpu.memory_space<vmem>>, vector<1x128xf32>
    %c0_7 = arith.constant 0 : index
    %c0_8 = arith.constant 0 : index
    %4 = vector.load %arg6[%c0_7, %c0_8] : memref<128x128xf32, #tpu.memory_space<vmem>>, vector<128x128xf32>
    %c0_9 = arith.constant 0 : index
    %c0_10 = arith.constant 0 : index
    %5 = vector.load %arg7[%c0_9, %c0_10] : memref<1x128xf32, #tpu.memory_space<vmem>>, vector<1x128xf32>
    %c0_11 = arith.constant 0 : index
    %c0_12 = arith.constant 0 : index
    %6 = vector.load %arg8[%c0_11, %c0_12] : memref<128x64xf32, #tpu.memory_space<vmem>>, vector<128x64xf32>
    %c0_13 = arith.constant 0 : index
    %c0_14 = arith.constant 0 : index
    %7 = vector.load %arg9[%c0_13, %c0_14] : memref<1x64xf32, #tpu.memory_space<vmem>>, vector<1x64xf32>
    %c0_i32 = arith.constant 0 : i32
    %8 = arith.index_cast %c0_i32 : i32 to index
    %c0_15 = arith.constant 0 : index
    %c0_16 = arith.constant 0 : index
    %9 = vector.load %arg1[%8, %c0_15, %c0_16] : memref<1x51x22xf32, #tpu.memory_space<vmem>>, vector<1x51x22xf32>
    %10 = vector.shape_cast %9 : vector<1x51x22xf32> to vector<51x22xf32>
    %cst = arith.constant dense<0.000000e+00> : vector<51x128xf32>
    %11 = tpu.matmul %10, %1, %cst {dimension_numbers = #tpu.dot_dimension_numbers<[1], [0], [0], [1], [0, 0, 1, 1], [], []>} : vector<51x22xf32>, vector<22x128xf32>, vector<51x128xf32> -> vector<51x128xf32>
    %cst_17 = arith.constant dense<0.000000e+00> : vector<625x128xf32>
    %12 = tpu.matmul %0, %11, %cst_17 {dimension_numbers = #tpu.dot_dimension_numbers<[1], [0], [0], [1], [0, 0, 1, 1], [], []>} : vector<625x51xf32>, vector<51x128xf32>, vector<625x128xf32> -> vector<625x128xf32>
    %cst_18 = arith.constant 0.00999999977 : f32
    %13 = vector.broadcast %cst_18 : f32 to vector<625x128xf32>
    %14 = arith.mulf %13, %12 : vector<625x128xf32>
    %15 = arith.maximumf %12, %14 : vector<625x128xf32>
    %cst_19 = arith.constant dense<0.000000e+00> : vector<625x128xf32>
    %16 = tpu.matmul %15, %2, %cst_19 {dimension_numbers = #tpu.dot_dimension_numbers<[1], [0], [0], [1], [0, 0, 1, 1], [], []>} : vector<625x128xf32>, vector<128x128xf32>, vector<625x128xf32> -> vector<625x128xf32>
    %17 = vector.broadcast %3 : vector<1x128xf32> to vector<625x128xf32>
    %18 = arith.addf %16, %17 : vector<625x128xf32>
    %cst_20 = arith.constant 0.00999999977 : f32
    %19 = vector.broadcast %cst_20 : f32 to vector<625x128xf32>
    %20 = arith.mulf %19, %18 : vector<625x128xf32>
    %21 = arith.maximumf %18, %20 : vector<625x128xf32>
    %cst_21 = arith.constant dense<0.000000e+00> : vector<128xf32>
    %22 = vector.multi_reduction <add>, %21, %cst_21 [0] : vector<625x128xf32> to vector<128xf32>
    %23 = vector.shape_cast %22 : vector<128xf32> to vector<1x128xf32>
    %cst_22 = arith.constant dense<0.000000e+00> : vector<1x128xf32>
    %24 = tpu.matmul %23, %4, %cst_22 {dimension_numbers = #tpu.dot_dimension_numbers<[1], [0], [0], [1], [0, 0, 1, 1], [], []>} : vector<1x128xf32>, vector<128x128xf32>, vector<1x128xf32> -> vector<1x128xf32>
    %25 = arith.addf %24, %5 : vector<1x128xf32>
    %cst_23 = arith.constant 0.00999999977 : f32
    %26 = vector.broadcast %cst_23 : f32 to vector<1x128xf32>
    %27 = arith.mulf %26, %25 : vector<1x128xf32>
    %28 = arith.maximumf %25, %27 : vector<1x128xf32>
    %cst_24 = arith.constant dense<0.000000e+00> : vector<1x64xf32>
    %29 = tpu.matmul %28, %6, %cst_24 {dimension_numbers = #tpu.dot_dimension_numbers<[1], [0], [0], [1], [0, 0, 1, 1], [], []>} : vector<1x128xf32>, vector<128x64xf32>, vector<1x64xf32> -> vector<1x64xf32>
    %30 = arith.addf %29, %7 : vector<1x64xf32>
    %cst_25 = arith.constant 0.00999999977 : f32
    %31 = vector.broadcast %cst_25 : f32 to vector<1x64xf32>
    %32 = arith.mulf %31, %30 : vector<1x64xf32>
    %33 = arith.maximumf %30, %32 : vector<1x64xf32>
    %34 = vector.extract_strided_slice %33 {offsets = [0, 0], sizes = [1, 32], strides = [1, 1]} : vector<1x64xf32> to vector<1x32xf32>
    %c2_i32 = arith.constant 2 : i32
    %35 = arith.muli %c2_i32, %c0_i32 : i32
    %36 = arith.index_cast %35 : i32 to index
    %c0_26 = arith.constant 0 : index
    %37 = vector.load %arg10[%36, %c0_26] : memref<2x32xf32, #tpu.memory_space<vmem>>, vector<1x32xf32>
    tpu.vector_store %arg10[%36, %c0_26], %34 {strides = array<i32>} : memref<2x32xf32, #tpu.memory_space<vmem>>, vector<1x32xf32>,
    %38 = vector.extract_strided_slice %33 {offsets = [0, 32], sizes = [1, 32], strides = [1, 1]} : vector<1x64xf32> to vector<1x32xf32>
    %c2_i32_27 = arith.constant 2 : i32
    %39 = arith.muli %c2_i32_27, %c0_i32 : i32
    %c1_i32 = arith.constant 1 : i32
    %40 = arith.addi %39, %c1_i32 : i32
    %41 = arith.index_cast %40 : i32 to index
    %c0_28 = arith.constant 0 : index
    %42 = vector.load %arg10[%41, %c0_28] : memref<2x32xf32, #tpu.memory_space<vmem>>, vector<1x32xf32>
    tpu.vector_store %arg10[%41, %c0_28], %38 {strides = array<i32>} : memref<2x32xf32, #tpu.memory_space<vmem>>, vector<1x32xf32>,
    %c1_i32_29 = arith.constant 1 : i32
    return
  }
  func.func @transform_0(%arg0: i32) -> (i32, i32, i32) {
    %c0_i32 = arith.constant 0 : i32
    %c0_i32_0 = arith.constant 0 : i32
    %c0_i32_1 = arith.constant 0 : i32
    return %arg0, %c0_i32, %c0_i32_0 : i32, i32, i32
  }
  func.func @transform_1(%arg0: i32) -> (i32, i32) {
    %c0_i32 = arith.constant 0 : i32
    %c0_i32_0 = arith.constant 0 : i32
    %c0_i32_1 = arith.constant 0 : i32
    return %c0_i32, %c0_i32_0 : i32, i32
  }
  func.func @transform_2(%arg0: i32) -> (i32, i32) {
    %c0_i32 = arith.constant 0 : i32
    %c0_i32_0 = arith.constant 0 : i32
    %c0_i32_1 = arith.constant 0 : i32
    return %c0_i32, %c0_i32_0 : i32, i32
  }
  func.func @transform_3(%arg0: i32) -> (i32, i32) {
    %c0_i32 = arith.constant 0 : i32
    %c0_i32_0 = arith.constant 0 : i32
    %c0_i32_1 = arith.constant 0 : i32
    return %c0_i32, %c0_i32_0 : i32, i32
  }
  func.func @transform_4(%arg0: i32) -> (i32, i32) {
    %c0_i32 = arith.constant 0 : i32
    %c0_i32_0 = arith.constant 0 : i32
    %c0_i32_1 = arith.constant 0 : i32
    return %c0_i32, %c0_i32_0 : i32, i32
  }
  func.func @transform_5(%arg0: i32) -> (i32, i32) {
    %c0_i32 = arith.constant 0 : i32
    %c0_i32_0 = arith.constant 0 : i32
    %c0_i32_1 = arith.constant 0 : i32
    return %c0_i32, %c0_i32_0 : i32, i32
  }
  func.func @transform_6(%arg0: i32) -> (i32, i32) {
    %c0_i32 = arith.constant 0 : i32
    %c0_i32_0 = arith.constant 0 : i32
    %c0_i32_1 = arith.constant 0 : i32
    return %c0_i32, %c0_i32_0 : i32, i32
  }
  func.func @transform_7(%arg0: i32) -> (i32, i32) {
    %c0_i32 = arith.constant 0 : i32
    %c0_i32_0 = arith.constant 0 : i32
    %c0_i32_1 = arith.constant 0 : i32
    return %c0_i32, %c0_i32_0 : i32, i32
  }
  func.func @transform_8(%arg0: i32) -> (i32, i32) {
    %c0_i32 = arith.constant 0 : i32
    %c0_i32_0 = arith.constant 0 : i32
    %c0_i32_1 = arith.constant 0 : i32
    return %c0_i32, %c0_i32_0 : i32, i32
  }
  func.func @transform_9(%arg0: i32) -> (i32, i32) {
    %c0_i32 = arith.constant 0 : i32
    %c0_i32_0 = arith.constant 0 : i32
    return %arg0, %c0_i32 : i32, i32
  }
}

</mosaic_0001>

<bundles_post_ra>
// kernel: tpu_custom_call.1
= control target key start
LH: loop header
LB: loop body
LE: loop exit
PB: predicated region body
PF: predicated region fallthrough
CT: control target
= control target key end

     0   :  { %v3079_v2 = vmov 0.0|0.0   ;;  %vm3080_vm0 = vmmov 0   ;;  %v3081_v4 = vmov 0.0   ;;  %s4102_s0 = inlined_call_operand.vmem [shape: f32[1,51,22], index: 0, kind: input, shape index: {}]   ;;  %s4103_s1 = inlined_call_operand.vmem [shape: f32[625,51], index: 1, kind: input, shape index: {}]   ;;  %s4104_s2 = inlined_call_operand.vmem [shape: f32[22,128], index: 2, kind: input, shape index: {}]   ;;  %s4105_s3 = inlined_call_operand.vmem [shape: f32[128,128], index: 3, kind: input, shape index: {}]   ;;  %s4106_s4 = inlined_call_operand.vmem [shape: f32[1,128], index: 4, kind: input, shape index: {}]   ;;  %s4107_s5 = inlined_call_operand.vmem [shape: f32[128,128], index: 5, kind: input, shape index: {}]   ;;  %s4108_s6 = inlined_call_operand.vmem [shape: f32[1,128], index: 6, kind: input, shape index: {}]   ;;  %s4109_s7 = inlined_call_operand.vmem [shape: f32[128,64], index: 7, kind: input, shape index: {}]   ;;  %s4110_s8 = inlined_call_operand.vmem [shape: f32[1,64], index: 8, kind: input, shape index: {}]   ;;  %s4111_s9 = inlined_call_operand.hbm [shape: f32[2,32], index: 9, kind: output, shape index: {}]  }
   0x1   :  { %v112_v0 = vld [vmem:[%s4104_s2] sm:$0xff]  ;;  %v113_v1 = vld [vmem:[%s4104_s2 + $0x8] sm:$0xff]  ;;  %2965 = vmatprep.subr.bf16.mxu1 %v3079_v2  ;;  %2977 = vmatprep.subr.bf16.mxu0 %v3079_v2 }
   0x2   :  { %v2966_v3 = vpack.c.bf16 %v113_v1, %v112_v0  ;;  %2354 = vmatprep.mubr.msk.f32.mxu1 %vm3080_vm0, %v3081_v4  ;;  %2658 = vmatprep.mubr.msk.f32.mxu0 %vm3080_vm0, %v3081_v4 }
   0x4   :  { %2967 = vmatpush3.bf16.msra.mxu1 %v2966_v3 }
   0x5   :  { %14 = vsyncpa [#allocation3], 0  ;;  %2352 = vmatprep.subr.mxu1 %v3081_v4  ;;  %v114_v5 = vld [vmem:[%s4104_s2 + $0x10] sm:$0x3f]  ;;  %vm195_vm1 = vcmask 1045504   ;;  %v166_v6 = vld [vmem:[%s4102_s0] sm:$0xff] }
   0x6   :  { %vm173_vm2 = vcmask 179200   ;;  %v167_v7 = vld [vmem:[%s4102_s0 + $0x8] sm:$0xff]  ;;  %v168_v8 = vld [vmem:[%s4102_s0 + $0x10] sm:$0xff]  ;;  %v169_v9 = vld [vmem:[%s4102_s0 + $0x18] sm:$0xff]  ;;  %vm537_vm3 = vcmask 1042432   ;;  %vm299_vm4 = vcmask 416768  }
   0x7   :  { %v170_v10 = vld [vmem:[%s4102_s0 + $0x20] sm:$0xff]  ;;  %v171_v11 = vld [vmem:[%s4102_s0 + $0x28] sm:$0xff]  ;;  %v172_v12 = vld [vmem:[%s4102_s0 + $0x30] sm:$0x7]  ;;  %vm1860_vm5 = vcmask 1040384   ;;  %vm2013_vm6 = vcmask 253952  }
   0x8   :  { %2353 = vmatpush3.msk.msra.mxu1 %vm195_vm1, %v114_v5  ;;  %v33_v29 = vld [vmem:[%s4103_s1] sm:$0xff]  ;;  %v34_v31 = vld [vmem:[%s4103_s1 + $0x8] sm:$0xff]  ;;  %v35_v32 = vld [vmem:[%s4103_s1 + $0x10] sm:$0xff]  ;;  %s3082_s22 = smov 96  }
   0x9   :  { %2355 = vmatmul.mubr.msk.f32.vlgmr.msra.gmra.mrb[0].mxu1 %vm173_vm2, %v166_v6  ;;  %2968 = vmatprep.subr.bf16.mxu1 %v3079_v2  ;;  %v36_v33 = vld [vmem:[%s4103_s1 + $0x18] sm:$0xff]  ;;  %v37_v34 = vld [vmem:[%s4103_s1 + $0x20] sm:$0xff]  ;;  %v38_v35 = vld [vmem:[%s4103_s1 + $0x28] sm:$0xff] }
   0xa   :  { %2357 = vmatprep.mubr.msk.f32.mxu1 %vm3080_vm0, %v3081_v4  ;;  %v39_v36 = vld [vmem:[%s4103_s1 + $0x30] sm:$0xff]  ;;  %v40_v37 = vld [vmem:[%s4103_s1 + $0x38] sm:$0xff]  ;;  %v41_v38 = vld [vmem:[%s4103_s1 + $0x40] sm:$0xff] }
   0xb   :  { %v42_v39 = vld [vmem:[%s4103_s1 + $0x48] sm:$0xff]  ;;  %v43_v40 = vld [vmem:[%s4103_s1 + $0x50] sm:$0xff]  ;;  %v44_v41 = vld [vmem:[%s4103_s1 + $0x58] sm:$0xff] }
   0xc   :  { %v45_v42 = vld [vmem:[%s4103_s1 + $0x60] sm:$0xff]  ;;  %v46_v43 = vld [vmem:[%s4103_s1 + $0x68] sm:$0xff]  ;;  %v47_v44 = vld [vmem:[%s4103_s1 + $0x70] sm:$0xff] }
   0xd   :  { %2358 = vmatmul.mubr.msk.f32.gmra.mrb[2].mxu1 %vm173_vm2, %v167_v7  ;;  %v115_v45 = vld [vmem:[%s4105_s3] sm:$0xff]  ;;  %v116_v46 = vld [vmem:[%s4105_s3 + $0x8] sm:$0xff]  ;;  %v48_v48 = vld [vmem:[%s4103_s1 + $0x78] sm:$0xff] }
   0xe   :  { %2360 = vmatprep.mubr.msk.f32.mxu1 %vm3080_vm0, %v3081_v4  ;;  %v2978_v47 = vpack.c.bf16 %v116_v46, %v115_v45  ;;  %v117_v49 = vld [vmem:[%s4105_s3 + $0x10] sm:$0xff]  ;;  %v118_v50 = vld [vmem:[%s4105_s3 + $0x18] sm:$0xff]  ;;  %v49_v52 = vld [vmem:[%s4103_s1 + $0x80] sm:$0xff] }
   0xf   :  { %v2981_v51 = vpack.c.bf16 %v118_v50, %v117_v49  ;;  %v119_v53 = vld [vmem:[%s4105_s3 + $0x20] sm:$0xff]  ;;  %v120_v54 = vld [vmem:[%s4105_s3 + $0x28] sm:$0xff]  ;;  %v121_v57 = vld [vmem:[%s4105_s3 + $0x30] sm:$0xff] }
  0x10   :  { %2979 = vmatpush3.bf16.msra.mxu0 %v2978_v47  ;;  %v2984_v55 = vpack.c.bf16 %v120_v54, %v119_v53  ;;  %v50_v56 = vld [vmem:[%s4103_s1 + $0x88] sm:$0xff]  ;;  %v122_v58 = vld [vmem:[%s4105_s3 + $0x38] sm:$0xff]  ;;  %v51_v60 = vld [vmem:[%s4103_s1 + $0x90] sm:$0xff] }
  0x11   :  { %2361 = vmatmul.mubr.msk.f32.gmra.mrb[4].mxu1 %vm173_vm2, %v168_v8  ;;  %2980 = vmatprep.subr.bf16.mxu0 %v3079_v2  ;;  %v2987_v59 = vpack.c.bf16 %v122_v58, %v121_v57  ;;  %v123_v61 = vld [vmem:[%s4105_s3 + $0x40] sm:$0xff]  ;;  %v124_v62 = vld [vmem:[%s4105_s3 + $0x48] sm:$0xff]  ;;  %v52_v0 = vld [vmem:[%s4103_s1 + $0x98] sm:$0xff] }
  0x12   :  { %2363 = vmatprep.mubr.msk.f32.mxu1 %vm3080_vm0, %v3081_v4  ;;  %v2990_v63 = vpack.c.bf16 %v124_v62, %v123_v61  ;;  %v125_v1 = vld [vmem:[%s4105_s3 + $0x50] sm:$0xff]  ;;  %v126_v3 = vld [vmem:[%s4105_s3 + $0x58] sm:$0xff]  ;;  %v53_v6 = vld [vmem:[%s4103_s1 + $0xa0] sm:$0xff] }
  0x13   :  { %v2993_v5 = vpack.c.bf16 %v126_v3, %v125_v1  ;;  %v127_v7 = vld [vmem:[%s4105_s3 + $0x60] sm:$0xff]  ;;  %v128_v8 = vld [vmem:[%s4105_s3 + $0x68] sm:$0xff]  ;;  %v87_v49 = vld [vmem:[%s4103_s1 + $0x1b0] sm:$0xff] }
  0x14   :  { %2982 = vmatpush3.bf16.msra.mxu0 %v2981_v51  ;;  %v86_v45 = vld [vmem:[%s4103_s1 + $0x1a8] sm:$0xff]  ;;  %v88_v54 = vld [vmem:[%s4103_s1 + $0x1b8] sm:$0xff] }
  0x15   :  { %2364 = vmatmul.mubr.msk.f32.gmra.mrb[6].mxu1 %vm173_vm2, %v169_v9  ;;  %2983 = vmatprep.subr.bf16.mxu0 %v3079_v2  ;;  %v2996_v9 = vpack.c.bf16 %v128_v8, %v127_v7  ;;  %v91_v7 = vld [vmem:[%s4103_s1 + $0x1d0] sm:$0xff] }
  0x16   :  { %2366 = vmatprep.mubr.msk.f32.mxu1 %vm3080_vm0, %v3081_v4 }
  0x18   :  { %2985 = vmatpush3.bf16.msra.mxu0 %v2984_v55 }
  0x19   :  { %2367 = vmatmul.mubr.msk.f32.gmra.mrb[8].mxu1 %vm173_vm2, %v170_v10  ;;  %2986 = vmatprep.subr.bf16.mxu0 %v3079_v2  ;;  %v54_v10 = vld [vmem:[%s4103_s1 + $0xa8] sm:$0xff] }
  0x1a   :  { %2369 = vmatprep.mubr.msk.f32.mxu1 %vm3080_vm0, %v3081_v4 }
  0x1c   :  { %2988 = vmatpush3.bf16.msra.mxu0 %v2987_v59  ;;  %v89_v59 = vld [vmem:[%s4103_s1 + $0x1c0] sm:$0xff] }
  0x1d   :  { %2370 = vmatmul.mubr.msk.f32.gmra.mrb[10].mxu1 %vm173_vm2, %v171_v11  ;;  %2989 = vmatprep.subr.bf16.mxu0 %v3079_v2  ;;  %v129_v11 = vld [vmem:[%s4105_s3 + $0x70] sm:$0xff] }
  0x1e   :  { %2372 = vmatprep.mubr.msk.f32.mxu1 %vm3080_vm0, %v3081_v4 }
  0x20   :  { %2991 = vmatpush3.bf16.msra.mxu0 %v2990_v63 }
  0x21   :  { %2373 = vmatmul.mubr.msk.f32.gmra.mrb[12].mxu1 %vm173_vm2, %v172_v12  ;;  %2992 = vmatprep.subr.bf16.mxu0 %v3079_v2  ;;  %v130_v12 = vld [vmem:[%s4105_s3 + $0x78] sm:$0xff] }
  0x22   :  { %2389 = vmatprep.mubr.msk.f32.mxu1 %vm3080_vm0, %v3081_v4 }
  0x24   :  { %2994 = vmatpush3.bf16.msra.mxu0 %v2993_v5 }
  0x25   :  { %2995 = vmatprep.subr.bf16.mxu0 %v3079_v2 }
  0x28   :  { %2997 = vmatpush3.bf16.msra.mxu0 %v2996_v9 }
  0x29   :  { %2998 = vmatprep.subr.bf16.mxu0 %v3079_v2 }
  0xdc   :  { %v265_v13 = vpop.f32.mrb[0].mxu1 }
  0xdd   :  { %v2356_v14 = vpop.f32.mrb[1].mxu1 }
  0xde   :  { %v55_v14 = vld [vmem:[%s4103_s1 + $0xb0] sm:$0xff] }
  0xe0   :  { %v270_v15 = vpop.f32.mrb[2].mxu1 }
  0xe1   :  { %v2969_v16 = vpack.c.bf16 %v270_v15, %v265_v13  ;;  %v2359_v17 = vpop.f32.mrb[3].mxu1  ;;  %v2999_v13 = vpack.c.bf16 %v130_v12, %v129_v11  ;;  %v56_v15 = vld [vmem:[%s4103_s1 + $0xb8] sm:$0xff] }
  0xe2   :  { %v58_v17 = vld [vmem:[%s4103_s1 + $0xc8] sm:$0xff]  ;;  %v92_v12 = vld [vmem:[%s4103_s1 + $0x1d8] sm:$0xff] }
  0xe3   :  { %2970 = vmatpush3.bf16.msra.mxu1 %v2969_v16  ;;  %3000 = vmatpush3.bf16.msra.mxu0 %v2999_v13  ;;  %v57_v16 = vld [vmem:[%s4103_s1 + $0xc0] sm:$0xff] }
  0xe4   :  { %v275_v18 = vpop.f32.mrb[4].mxu1  ;;  %2971 = vmatprep.subr.bf16.mxu1 %v3079_v2  ;;  %3025 = vmatprep.subr.bf16.mxu0 %v3079_v2 }
  0xe5   :  { %v2362_v19 = vpop.f32.mrb[5].mxu1 }
  0xe6   :  { %v60_v19 = vld [vmem:[%s4103_s1 + $0xd8] sm:$0xff] }
  0xe8   :  { %v280_v20 = vpop.f32.mrb[6].mxu1 }
  0xe9   :  { %v2972_v21 = vpack.c.bf16 %v280_v20, %v275_v18  ;;  %v2365_v22 = vpop.f32.mrb[7].mxu1  ;;  %v59_v18 = vld [vmem:[%s4103_s1 + $0xd0] sm:$0xff]  ;;  %v61_v20 = vld [vmem:[%s4103_s1 + $0xe0] sm:$0xff] }
  0xea   :  { %v63_v22 = vld [vmem:[%s4103_s1 + $0xf0] sm:$0xff] }
  0xeb   :  { %2973 = vmatpush3.bf16.msra.mxu1 %v2972_v21  ;;  %v62_v21 = vld [vmem:[%s4103_s1 + $0xe8] sm:$0xff] }
  0xec   :  { %v285_v23 = vpop.f32.mrb[8].mxu1  ;;  %2974 = vmatprep.subr.bf16.mxu1 %v3079_v2 }
  0xed   :  { %v2368_v24 = vpop.f32.mrb[9].mxu1 }
  0xee   :  { %v65_v24 = vld [vmem:[%s4103_s1 + $0x100] sm:$0xff] }
  0xf0   :  { %v290_v25 = vpop.f32.mrb[10].mxu1 }
  0xf1   :  { %v2975_v26 = vpack.c.bf16 %v290_v25, %v285_v23  ;;  %v2371_v27 = vpop.f32.mrb[11].mxu1  ;;  %v64_v23 = vld [vmem:[%s4103_s1 + $0xf8] sm:$0xff]  ;;  %v66_v25 = vld [vmem:[%s4103_s1 + $0x108] sm:$0xff] }
  0xf2   :  { %v68_v27 = vld [vmem:[%s4103_s1 + $0x118] sm:$0xff] }
  0xf3   :  { %2976 = vmatpush3.bf16.msra.mxu1 %v2975_v26  ;;  %v67_v26 = vld [vmem:[%s4103_s1 + $0x110] sm:$0xff] }
  0xf4   :  { %v295_v28 = vpop.f32.mrb[12].mxu1  ;;  %2387 = vmatprep.subr.mxu1 %v3081_v4 }
  0xf5   :  { %v2374_v30 = vpop.f32.mrb[13].mxu1 }
  0xf6   :  { %v71_v30 = vld [vmem:[%s4103_s1 + $0x130] sm:$0xff] }
  0xf7   :  { %2388 = vmatpush3.msk.msra.mxu1 %vm537_vm3, %v295_v28  ;;  %v69_v28 = vld [vmem:[%s4103_s1 + $0x120] sm:$0xff] }
  0xf8   :  { %2390 = vmatmul.mubr.msk.f32.vlgmr.msra.gmra.mrb[14].mxu1 %vm299_vm4, %v33_v29  ;;  %3001 = vmatprep.subr.bf16.mxu1 %v3079_v2  ;;  %v70_v29 = vld [vmem:[%s4103_s1 + $0x128] sm:$0xff] }
  0xf9   :  { %2392 = vmatprep.mubr.msk.f32.mxu1 %vm3080_vm0, %v3081_v4 }
  0xfc   :  { %2393 = vmatmul.mubr.msk.f32.gmra.mrb[16].mxu1 %vm299_vm4, %v34_v31  ;;  %v72_v31 = vld [vmem:[%s4103_s1 + $0x138] sm:$0xff] }
  0xfd   :  { %2395 = vmatprep.mubr.msk.f32.mxu1 %vm3080_vm0, %v3081_v4 }
 0x100   :  { %2396 = vmatmul.mubr.msk.f32.gmra.mrb[18].mxu1 %vm299_vm4, %v35_v32  ;;  %v73_v32 = vld [vmem:[%s4103_s1 + $0x140] sm:$0xff] }
 0x101   :  { %2398 = vmatprep.mubr.msk.f32.mxu1 %vm3080_vm0, %v3081_v4 }
 0x104   :  { %2399 = vmatmul.mubr.msk.f32.gmra.mrb[20].mxu1 %vm299_vm4, %v36_v33  ;;  %v74_v33 = vld [vmem:[%s4103_s1 + $0x148] sm:$0xff] }
 0x105   :  { %2401 = vmatprep.mubr.msk.f32.mxu1 %vm3080_vm0, %v3081_v4 }
 0x108   :  { %2402 = vmatmul.mubr.msk.f32.gmra.mrb[22].mxu1 %vm299_vm4, %v37_v34  ;;  %v75_v34 = vld [vmem:[%s4103_s1 + $0x150] sm:$0xff] }
 0x109   :  { %2404 = vmatprep.mubr.msk.f32.mxu1 %vm3080_vm0, %v3081_v4 }
 0x10c   :  { %2405 = vmatmul.mubr.msk.f32.gmra.mrb[24].mxu1 %vm299_vm4, %v38_v35  ;;  %v76_v35 = vld [vmem:[%s4103_s1 + $0x158] sm:$0xff] }
 0x10d   :  { %2407 = vmatprep.mubr.msk.f32.mxu1 %vm3080_vm0, %v3081_v4 }
 0x110   :  { %2408 = vmatmul.mubr.msk.f32.gmra.mrb[26].mxu1 %vm299_vm4, %v39_v36  ;;  %v77_v36 = vld [vmem:[%s4103_s1 + $0x160] sm:$0xff] }
 0x111   :  { %2410 = vmatprep.mubr.msk.f32.mxu1 %vm3080_vm0, %v3081_v4 }
 0x114   :  { %2411 = vmatmul.mubr.msk.f32.gmra.mrb[28].mxu1 %vm299_vm4, %v40_v37  ;;  %v78_v37 = vld [vmem:[%s4103_s1 + $0x168] sm:$0xff] }
 0x115   :  { %2413 = vmatprep.mubr.msk.f32.mxu1 %vm3080_vm0, %v3081_v4 }
 0x118   :  { %2414 = vmatmul.mubr.msk.f32.gmra.mrb[30].mxu1 %vm299_vm4, %v41_v38  ;;  %v79_v38 = vld [vmem:[%s4103_s1 + $0x170] sm:$0xff] }
 0x119   :  { %2416 = vmatprep.mubr.msk.f32.mxu1 %vm3080_vm0, %v3081_v4 }
 0x11c   :  { %2417 = vmatmul.mubr.msk.f32.gmra.mrb[32].mxu1 %vm299_vm4, %v42_v39  ;;  %v80_v39 = vld [vmem:[%s4103_s1 + $0x178] sm:$0xff] }
 0x11d   :  { %2419 = vmatprep.mubr.msk.f32.mxu1 %vm3080_vm0, %v3081_v4 }
 0x120   :  { %2420 = vmatmul.mubr.msk.f32.gmra.mrb[34].mxu1 %vm299_vm4, %v43_v40  ;;  %v81_v40 = vld [vmem:[%s4103_s1 + $0x180] sm:$0xff] }
 0x121   :  { %2422 = vmatprep.mubr.msk.f32.mxu1 %vm3080_vm0, %v3081_v4 }
 0x124   :  { %2423 = vmatmul.mubr.msk.f32.gmra.mrb[36].mxu1 %vm299_vm4, %v44_v41  ;;  %v82_v41 = vld [vmem:[%s4103_s1 + $0x188] sm:$0xff] }
 0x125   :  { %2425 = vmatprep.mubr.msk.f32.mxu1 %vm3080_vm0, %v3081_v4 }
 0x128   :  { %2426 = vmatmul.mubr.msk.f32.gmra.mrb[38].mxu1 %vm299_vm4, %v45_v42  ;;  %v83_v42 = vld [vmem:[%s4103_s1 + $0x190] sm:$0xff] }
 0x129   :  { %2428 = vmatprep.mubr.msk.f32.mxu1 %vm3080_vm0, %v3081_v4 }
 0x12c   :  { %2429 = vmatmul.mubr.msk.f32.gmra.mrb[40].mxu1 %vm299_vm4, %v46_v43  ;;  %v84_v43 = vld [vmem:[%s4103_s1 + $0x198] sm:$0xff] }
 0x12d   :  { %2431 = vmatprep.mubr.msk.f32.mxu1 %vm3080_vm0, %v3081_v4 }
 0x130   :  { %2432 = vmatmul.mubr.msk.f32.gmra.mrb[42].mxu1 %vm299_vm4, %v47_v44  ;;  %v85_v44 = vld [vmem:[%s4103_s1 + $0x1a0] sm:$0xff] }
 0x131   :  { %2434 = vmatprep.mubr.msk.f32.mxu1 %vm3080_vm0, %v3081_v4 }
 0x134   :  { %2435 = vmatmul.mubr.msk.f32.gmra.mrb[44].mxu1 %vm299_vm4, %v48_v48 }
 0x135   :  { %2437 = vmatprep.mubr.msk.f32.mxu1 %vm3080_vm0, %v3081_v4 }
 0x138   :  { %2438 = vmatmul.mubr.msk.f32.gmra.mrb[46].mxu1 %vm299_vm4, %v49_v52 }
 0x139   :  { %2440 = vmatprep.mubr.msk.f32.mxu1 %vm3080_vm0, %v3081_v4 }
 0x13c   :  { %2441 = vmatmul.mubr.msk.f32.gmra.mrb[48].mxu1 %vm299_vm4, %v50_v56 }
 0x13d   :  { %2443 = vmatprep.mubr.msk.f32.mxu1 %vm3080_vm0, %v3081_v4 }
 0x140   :  { %2444 = vmatmul.mubr.msk.f32.gmra.mrb[50].mxu1 %vm299_vm4, %v51_v60 }
 0x141   :  { %2446 = vmatprep.mubr.msk.f32.mxu1 %vm3080_vm0, %v3081_v4 }
 0x144   :  { %2447 = vmatmul.mubr.msk.f32.gmra.mrb[52].mxu1 %vm299_vm4, %v52_v0  ;;  %v90_v0 = vld [vmem:[%s4103_s1 + $0x1c8] sm:$0xff] }
 0x145   :  { %2449 = vmatprep.mubr.msk.f32.mxu1 %vm3080_vm0, %v3081_v4 }
 0x148   :  { %2450 = vmatmul.mubr.msk.f32.gmra.mrb[54].mxu1 %vm299_vm4, %v53_v6 }
 0x149   :  { %2452 = vmatprep.mubr.msk.f32.mxu1 %vm3080_vm0, %v3081_v4 }
 0x14c   :  { %2453 = vmatmul.mubr.msk.f32.gmra.mrb[56].mxu1 %vm299_vm4, %v54_v10 }
 0x14d   :  { %2455 = vmatprep.mubr.msk.f32.mxu1 %vm3080_vm0, %v3081_v4 }
 0x150   :  { %2456 = vmatmul.mubr.msk.f32.gmra.mrb[58].mxu1 %vm299_vm4, %v55_v14 }
 0x151   :  { %2458 = vmatprep.mubr.msk.f32.mxu1 %vm3080_vm0, %v3081_v4 }
 0x154   :  { %2459 = vmatmul.mubr.msk.f32.gmra.mrb[60].mxu1 %vm299_vm4, %v56_v15 }
 0x155   :  { %2461 = vmatprep.mubr.msk.f32.mxu1 %vm3080_vm0, %v3081_v4 }
 0x158   :  { %2462 = vmatmul.mubr.msk.f32.gmra.mrb[62].mxu1 %vm299_vm4, %v57_v16 }
 0x159   :  { %2464 = vmatprep.mubr.msk.f32.mxu1 %vm3080_vm0, %v3081_v4 }
 0x15c   :  { %2465 = vmatmul.mubr.msk.f32.gmra.mrb[64].mxu1 %vm299_vm4, %v58_v17  ;;  %v93_v17 = vld [vmem:[%s4103_s1 + $0x1e0] sm:$0xff] }
 0x15d   :  { %2467 = vmatprep.mubr.msk.f32.mxu1 %vm3080_vm0, %v3081_v4 }
 0x160   :  { %2468 = vmatmul.mubr.msk.f32.gmra.mrb[66].mxu1 %vm299_vm4, %v59_v18 }
 0x161   :  { %2470 = vmatprep.mubr.msk.f32.mxu1 %vm3080_vm0, %v3081_v4 }
 0x164   :  { %2471 = vmatmul.mubr.msk.f32.gmra.mrb[68].mxu1 %vm299_vm4, %v60_v19 }
 0x165   :  { %2473 = vmatprep.mubr.msk.f32.mxu1 %vm3080_vm0, %v3081_v4 }
 0x168   :  { %2474 = vmatmul.mubr.msk.f32.gmra.mrb[70].mxu1 %vm299_vm4, %v61_v20 }
 0x169   :  { %2476 = vmatprep.mubr.msk.f32.mxu1 %vm3080_vm0, %v3081_v4 }
 0x16c   :  { %2477 = vmatmul.mubr.msk.f32.gmra.mrb[72].mxu1 %vm299_vm4, %v62_v21 }
 0x16d   :  { %2479 = vmatprep.mubr.msk.f32.mxu1 %vm3080_vm0, %v3081_v4 }
 0x170   :  { %2480 = vmatmul.mubr.msk.f32.gmra.mrb[74].mxu1 %vm299_vm4, %v63_v22  ;;  %v94_v22 = vld [vmem:[%s4103_s1 + $0x1e8] sm:$0xff] }
 0x171   :  { %2482 = vmatprep.mubr.msk.f32.mxu1 %vm3080_vm0, %v3081_v4 }
 0x174   :  { %2483 = vmatmul.mubr.msk.f32.gmra.mrb[76].mxu1 %vm299_vm4, %v64_v23 }
 0x175   :  { %2485 = vmatprep.mubr.msk.f32.mxu1 %vm3080_vm0, %v3081_v4 }
 0x178   :  { %2486 = vmatmul.mubr.msk.f32.gmra.mrb[78].mxu1 %vm299_vm4, %v65_v24 }
 0x179   :  { %2488 = vmatprep.mubr.msk.f32.mxu1 %vm3080_vm0, %v3081_v4 }
 0x17c   :  { %2489 = vmatmul.mubr.msk.f32.gmra.mrb[80].mxu1 %vm299_vm4, %v66_v25 }
 0x17d   :  { %2491 = vmatprep.mubr.msk.f32.mxu1 %vm3080_vm0, %v3081_v4 }
 0x180   :  { %2492 = vmatmul.mubr.msk.f32.gmra.mrb[82].mxu1 %vm299_vm4, %v67_v26 }
 0x181   :  { %2494 = vmatprep.mubr.msk.f32.mxu1 %vm3080_vm0, %v3081_v4 }
 0x184   :  { %2495 = vmatmul.mubr.msk.f32.gmra.mrb[84].mxu1 %vm299_vm4, %v68_v27  ;;  %v95_v27 = vld [vmem:[%s4103_s1 + $0x1f0] sm:$0xff] }
 0x185   :  { %2497 = vmatprep.mubr.msk.f32.mxu1 %vm3080_vm0, %v3081_v4 }
 0x188   :  { %2498 = vmatmul.mubr.msk.f32.gmra.mrb[86].mxu1 %vm299_vm4, %v69_v28 }
 0x189   :  { %2500 = vmatprep.mubr.msk.f32.mxu1 %vm3080_vm0, %v3081_v4 }
 0x18c   :  { %2501 = vmatmul.mubr.msk.f32.gmra.mrb[88].mxu1 %vm299_vm4, %v70_v29 }
 0x18d   :  { %2503 = vmatprep.mubr.msk.f32.mxu1 %vm3080_vm0, %v3081_v4 }
 0x190   :  { %2504 = vmatmul.mubr.msk.f32.gmra.mrb[90].mxu1 %vm299_vm4, %v71_v30 }
 0x191   :  { %2506 = vmatprep.mubr.msk.f32.mxu1 %vm3080_vm0, %v3081_v4 }
 0x194   :  { %2507 = vmatmul.mubr.msk.f32.gmra.mrb[92].mxu1 %vm299_vm4, %v72_v31 }
 0x195   :  { %2509 = vmatprep.mubr.msk.f32.mxu1 %vm3080_vm0, %v3081_v4 }
 0x198   :  { %2510 = vmatmul.mubr.msk.f32.gmra.mrb[94].mxu1 %vm299_vm4, %v73_v32  ;;  %v96_v32 = vld [vmem:[%s4103_s1 + $0x1f8] sm:$0xff] }
 0x199   :  { %2512 = vmatprep.mubr.msk.f32.mxu1 %vm3080_vm0, %v3081_v4 }
 0x19c   :  { %2513 = vmatmul.mubr.msk.f32.gmra.mrb[96].mxu1 %vm299_vm4, %v74_v33 }
 0x19d   :  { %2515 = vmatprep.mubr.msk.f32.mxu1 %vm3080_vm0, %v3081_v4 }
 0x1a0   :  { %2516 = vmatmul.mubr.msk.f32.gmra.mrb[98].mxu1 %vm299_vm4, %v75_v34 }
 0x1a1   :  { %2518 = vmatprep.mubr.msk.f32.mxu1 %vm3080_vm0, %v3081_v4 }
 0x1a4   :  { %2519 = vmatmul.mubr.msk.f32.gmra.mrb[100].mxu1 %vm299_vm4, %v76_v35 }
 0x1a5   :  { %2521 = vmatprep.mubr.msk.f32.mxu1 %vm3080_vm0, %v3081_v4 }
 0x1a8   :  { %2522 = vmatmul.mubr.msk.f32.gmra.mrb[102].mxu1 %vm299_vm4, %v77_v36 }
 0x1a9   :  { %2524 = vmatprep.mubr.msk.f32.mxu1 %vm3080_vm0, %v3081_v4 }
 0x1ac   :  { %2525 = vmatmul.mubr.msk.f32.gmra.mrb[104].mxu1 %vm299_vm4, %v78_v37  ;;  %v97_v37 = vld [vmem:[%s4103_s1 + $0x200] sm:$0xff] }
 0x1ad   :  { %2527 = vmatprep.mubr.msk.f32.mxu1 %vm3080_vm0, %v3081_v4 }
 0x1b0   :  { %2528 = vmatmul.mubr.msk.f32.gmra.mrb[106].mxu1 %vm299_vm4, %v79_v38 }
 0x1b1   :  { %2530 = vmatprep.mubr.msk.f32.mxu1 %vm3080_vm0, %v3081_v4 }
 0x1b4   :  { %2531 = vmatmul.mubr.msk.f32.gmra.mrb[108].mxu1 %vm299_vm4, %v80_v39 }
 0x1b5   :  { %2533 = vmatprep.mubr.msk.f32.mxu1 %vm3080_vm0, %v3081_v4 }
 0x1b8   :  { %2534 = vmatmul.mubr.msk.f32.gmra.mrb[110].mxu1 %vm299_vm4, %v81_v40 }
 0x1b9   :  { %2536 = vmatprep.mubr.msk.f32.mxu1 %vm3080_vm0, %v3081_v4 }
 0x1bc   :  { %2537 = vmatmul.mubr.msk.f32.gmra.mrb[112].mxu1 %vm299_vm4, %v82_v41 }
 0x1bd   :  { %2539 = vmatprep.mubr.msk.f32.mxu1 %vm3080_vm0, %v3081_v4 }
 0x1c0   :  { %2540 = vmatmul.mubr.msk.f32.gmra.mrb[114].mxu1 %vm299_vm4, %v83_v42  ;;  %v98_v42 = vld [vmem:[%s4103_s1 + $0x208] sm:$0xff] }
 0x1c1   :  { %2542 = vmatprep.mubr.msk.f32.mxu1 %vm3080_vm0, %v3081_v4 }
 0x1c4   :  { %2543 = vmatmul.mubr.msk.f32.gmra.mrb[116].mxu1 %vm299_vm4, %v84_v43 }
 0x1c5   :  { %2545 = vmatprep.mubr.msk.f32.mxu1 %vm3080_vm0, %v3081_v4 }
 0x1c8   :  { %2546 = vmatmul.mubr.msk.f32.gmra.mrb[118].mxu1 %vm299_vm4, %v85_v44 }
 0x1c9   :  { %2548 = vmatprep.mubr.msk.f32.mxu1 %vm3080_vm0, %v3081_v4 }
 0x1cb   :  { %v607_v46 = vpop.f32.mrb[14].mxu1 }
 0x1cc   :  { %v1001_v47 = vmul.f32 0.01, %v607_v46  ;;  %2549 = vmatmul.mubr.msk.f32.gmra.mrb[120].mxu1 %vm299_vm4, %v86_v45  ;;  %v2391_v48 = vpop.f32.mrb[15].mxu1 }
 0x1cd   :  { %2551 = vmatprep.mubr.msk.f32.mxu1 %vm3080_vm0, %v3081_v4 }
 0x1ce   :  { %v1080_v50 = vmax.f32 %v607_v46, %v1001_v47  ;;  %v99_v47 = vld [vmem:[%s4103_s1 + $0x210] sm:$0xff] }
 0x1cf   :  { %v612_v51 = vpop.f32.mrb[16].mxu1 }
 0x1d0   :  { %v1002_v52 = vmul.f32 0.01, %v612_v51  ;;  %2552 = vmatmul.mubr.msk.f32.gmra.mrb[122].mxu1 %vm299_vm4, %v87_v49  ;;  %2659 = vmatmul.mubr.f32.vlgmr.msra.gmra.mrb[0].mxu0 %v1080_v50  ;;  %v2394_v53 = vpop.f32.mrb[17].mxu1 }
 0x1d1   :  { %2554 = vmatprep.mubr.msk.f32.mxu1 %vm3080_vm0, %v3081_v4  ;;  %2661 = vmatprep.mubr.msk.f32.mxu0 %vm3080_vm0, %v3081_v4 }
 0x1d2   :  { %v1081_v55 = vmax.f32 %v612_v51, %v1002_v52  ;;  %v100_v52 = vld [vmem:[%s4103_s1 + $0x218] sm:$0xff] }
 0x1d3   :  { %v617_v56 = vpop.f32.mrb[18].mxu1 }
 0x1d4   :  { %v1003_v57 = vmul.f32 0.01, %v617_v56  ;;  %2555 = vmatmul.mubr.msk.f32.gmra.mrb[124].mxu1 %vm299_vm4, %v88_v54  ;;  %2662 = vmatmul.mubr.f32.gmra.mrb[2].mxu0 %v1081_v55  ;;  %v2397_v58 = vpop.f32.mrb[19].mxu1 }
 0x1d5   :  { %2557 = vmatprep.mubr.msk.f32.mxu1 %vm3080_vm0, %v3081_v4  ;;  %2664 = vmatprep.mubr.msk.f32.mxu0 %vm3080_vm0, %v3081_v4 }
 0x1d6   :  { %v1082_v60 = vmax.f32 %v617_v56, %v1003_v57  ;;  %v101_v57 = vld [vmem:[%s4103_s1 + $0x220] sm:$0xff] }
 0x1d7   :  { %v622_v61 = vpop.f32.mrb[20].mxu1 }
 0x1d8   :  { %v1004_v62 = vmul.f32 0.01, %v622_v61  ;;  %2558 = vmatmul.mubr.msk.f32.gmra.mrb[126].mxu1 %vm299_vm4, %v89_v59  ;;  %2665 = vmatmul.mubr.f32.gmra.mrb[4].mxu0 %v1082_v60  ;;  %v2400_v63 = vpop.f32.mrb[21].mxu1 }
 0x1d9   :  { %2560 = vmatprep.mubr.msk.f32.mxu1 %vm3080_vm0, %v3081_v4  ;;  %2667 = vmatprep.mubr.msk.f32.mxu0 %vm3080_vm0, %v3081_v4 }
 0x1da   :  { %v1083_v1 = vmax.f32 %v622_v61, %v1004_v62  ;;  %v102_v62 = vld [vmem:[%s4103_s1 + $0x228] sm:$0xff] }
 0x1db   :  { %v627_v3 = vpop.f32.mrb[22].mxu1 }
 0x1dc   :  { %v1005_v5 = vmul.f32 0.01, %v627_v3  ;;  %2561 = vmatmul.mubr.msk.f32.gmra.mrb[128].mxu1 %vm299_vm4, %v90_v0  ;;  %2668 = vmatmul.mubr.f32.gmra.mrb[6].mxu0 %v1083_v1  ;;  %v2403_v6 = vpop.f32.mrb[23].mxu1 }
 0x1dd   :  { %2563 = vmatprep.mubr.msk.f32.mxu1 %vm3080_vm0, %v3081_v4  ;;  %2670 = vmatprep.mubr.msk.f32.mxu0 %vm3080_vm0, %v3081_v4 }
 0x1de   :  { %v1084_v8 = vmax.f32 %v627_v3, %v1005_v5  ;;  %v103_v5 = vld [vmem:[%s4103_s1 + $0x230] sm:$0xff] }
 0x1df   :  { %v632_v9 = vpop.f32.mrb[24].mxu1 }
 0x1e0   :  { %v1006_v10 = vmul.f32 0.01, %v632_v9  ;;  %2564 = vmatmul.mubr.msk.f32.gmra.mrb[130].mxu1 %vm299_vm4, %v91_v7  ;;  %2671 = vmatmul.mubr.f32.gmra.mrb[8].mxu0 %v1084_v8  ;;  %v2406_v11 = vpop.f32.mrb[25].mxu1 }
 0x1e1   :  { %2566 = vmatprep.mubr.msk.f32.mxu1 %vm3080_vm0, %v3081_v4  ;;  %2673 = vmatprep.mubr.msk.f32.mxu0 %vm3080_vm0, %v3081_v4 }
 0x1e2   :  { %v1085_v13 = vmax.f32 %v632_v9, %v1006_v10  ;;  %v104_v10 = vld [vmem:[%s4103_s1 + $0x238] sm:$0xff] }
 0x1e3   :  { %v637_v14 = vpop.f32.mrb[26].mxu1 }
 0x1e4   :  { %v1007_v15 = vmul.f32 0.01, %v637_v14  ;;  %2567 = vmatmul.mubr.msk.f32.gmra.mrb[132].mxu1 %vm299_vm4, %v92_v12  ;;  %2674 = vmatmul.mubr.f32.gmra.mrb[10].mxu0 %v1085_v13  ;;  %v2409_v16 = vpop.f32.mrb[27].mxu1 }
 0x1e5   :  { %2569 = vmatprep.mubr.msk.f32.mxu1 %vm3080_vm0, %v3081_v4  ;;  %2676 = vmatprep.mubr.msk.f32.mxu0 %vm3080_vm0, %v3081_v4 }
 0x1e6   :  { %v1086_v18 = vmax.f32 %v637_v14, %v1007_v15  ;;  %v105_v15 = vld [vmem:[%s4103_s1 + $0x240] sm:$0xff] }
 0x1e7   :  { %v642_v19 = vpop.f32.mrb[28].mxu1 }
 0x1e8   :  { %v1008_v20 = vmul.f32 0.01, %v642_v19  ;;  %2570 = vmatmul.mubr.msk.f32.gmra.mrb[134].mxu1 %vm299_vm4, %v93_v17  ;;  %2677 = vmatmul.mubr.f32.gmra.mrb[12].mxu0 %v1086_v18  ;;  %v2412_v21 = vpop.f32.mrb[29].mxu1 }
 0x1e9   :  { %2572 = vmatprep.mubr.msk.f32.mxu1 %vm3080_vm0, %v3081_v4  ;;  %2679 = vmatprep.mubr.msk.f32.mxu0 %vm3080_vm0, %v3081_v4 }
 0x1ea   :  { %v1087_v23 = vmax.f32 %v642_v19, %v1008_v20  ;;  %v106_v20 = vld [vmem:[%s4103_s1 + $0x248] sm:$0xff] }
 0x1eb   :  { %v647_v24 = vpop.f32.mrb[30].mxu1 }
 0x1ec   :  { %v1009_v25 = vmul.f32 0.01, %v647_v24  ;;  %2573 = vmatmul.mubr.msk.f32.gmra.mrb[136].mxu1 %vm299_vm4, %v94_v22  ;;  %2680 = vmatmul.mubr.f32.gmra.mrb[14].mxu0 %v1087_v23  ;;  %v2415_v26 = vpop.f32.mrb[31].mxu1 }
 0x1ed   :  { %2575 = vmatprep.mubr.msk.f32.mxu1 %vm3080_vm0, %v3081_v4  ;;  %2682 = vmatprep.mubr.msk.f32.mxu0 %vm3080_vm0, %v3081_v4 }
 0x1ee   :  { %v1088_v28 = vmax.f32 %v647_v24, %v1009_v25  ;;  %v107_v25 = vld [vmem:[%s4103_s1 + $0x250] sm:$0xff] }
 0x1ef   :  { %v652_v29 = vpop.f32.mrb[32].mxu1 }
 0x1f0   :  { %v1010_v30 = vmul.f32 0.01, %v652_v29  ;;  %2576 = vmatmul.mubr.msk.f32.gmra.mrb[138].mxu1 %vm299_vm4, %v95_v27  ;;  %2683 = vmatmul.mubr.f32.gmra.mrb[16].mxu0 %v1088_v28  ;;  %v2418_v31 = vpop.f32.mrb[33].mxu1 }
 0x1f1   :  { %2578 = vmatprep.mubr.msk.f32.mxu1 %vm3080_vm0, %v3081_v4  ;;  %2685 = vmatprep.mubr.msk.f32.mxu0 %vm3080_vm0, %v3081_v4 }
 0x1f2   :  { %v1089_v33 = vmax.f32 %v652_v29, %v1010_v30  ;;  %v108_v30 = vld [vmem:[%s4103_s1 + $0x258] sm:$0xff] }
 0x1f3   :  { %v657_v34 = vpop.f32.mrb[34].mxu1 }
 0x1f4   :  { %v1011_v35 = vmul.f32 0.01, %v657_v34  ;;  %2579 = vmatmul.mubr.msk.f32.gmra.mrb[140].mxu1 %vm299_vm4, %v96_v32  ;;  %2686 = vmatmul.mubr.f32.gmra.mrb[18].mxu0 %v1089_v33  ;;  %v2421_v36 = vpop.f32.mrb[35].mxu1 }
 0x1f5   :  { %2581 = vmatprep.mubr.msk.f32.mxu1 %vm3080_vm0, %v3081_v4  ;;  %2688 = vmatprep.mubr.msk.f32.mxu0 %vm3080_vm0, %v3081_v4 }
 0x1f6   :  { %v1090_v38 = vmax.f32 %v657_v34, %v1011_v35  ;;  %v109_v35 = vld [vmem:[%s4103_s1 + $0x260] sm:$0xff] }
 0x1f7   :  { %v662_v39 = vpop.f32.mrb[36].mxu1 }
 0x1f8   :  { %v1012_v40 = vmul.f32 0.01, %v662_v39  ;;  %2582 = vmatmul.mubr.msk.f32.gmra.mrb[142].mxu1 %vm299_vm4, %v97_v37  ;;  %2689 = vmatmul.mubr.f32.gmra.mrb[20].mxu0 %v1090_v38  ;;  %v2424_v41 = vpop.f32.mrb[37].mxu1 }
 0x1f9   :  { %2584 = vmatprep.mubr.msk.f32.mxu1 %vm3080_vm0, %v3081_v4  ;;  %2691 = vmatprep.mubr.msk.f32.mxu0 %vm3080_vm0, %v3081_v4 }
 0x1fa   :  { %v1091_v43 = vmax.f32 %v662_v39, %v1012_v40  ;;  %v110_v40 = vld [vmem:[%s4103_s1 + $0x268] sm:$0xff] }
 0x1fb   :  { %v667_v44 = vpop.f32.mrb[38].mxu1 }
 0x1fc   :  { %v1013_v45 = vmul.f32 0.01, %v667_v44  ;;  %2585 = vmatmul.mubr.msk.f32.gmra.mrb[144].mxu1 %vm299_vm4, %v98_v42  ;;  %2692 = vmatmul.mubr.f32.gmra.mrb[22].mxu0 %v1091_v43  ;;  %v2427_v46 = vpop.f32.mrb[39].mxu1 }
 0x1fd   :  { %2587 = vmatprep.mubr.msk.f32.mxu1 %vm3080_vm0, %v3081_v4  ;;  %2694 = vmatprep.mubr.msk.f32.mxu0 %vm3080_vm0, %v3081_v4 }
 0x1fe   :  { %v1092_v48 = vmax.f32 %v667_v44, %v1013_v45  ;;  %v111_v45 = vld [vmem:[%s4103_s1 + $0x270] sm:$0x1] }
 0x1ff   :  { %v672_v49 = vpop.f32.mrb[40].mxu1 }
 0x200   :  { %v1014_v50 = vmul.f32 0.01, %v672_v49  ;;  %2588 = vmatmul.mubr.msk.f32.gmra.mrb[146].mxu1 %vm299_vm4, %v99_v47  ;;  %2695 = vmatmul.mubr.f32.gmra.mrb[24].mxu0 %v1092_v48  ;;  %v2430_v51 = vpop.f32.mrb[41].mxu1 }
 0x201   :  { %2590 = vmatprep.mubr.msk.f32.mxu1 %vm3080_vm0, %v3081_v4  ;;  %2697 = vmatprep.mubr.msk.f32.mxu0 %vm3080_vm0, %v3081_v4 }
 0x202   :  { %v1093_v53 = vmax.f32 %v672_v49, %v1014_v50 }
 0x203   :  { %v677_v54 = vpop.f32.mrb[42].mxu1 }
 0x204   :  { %v1015_v55 = vmul.f32 0.01, %v677_v54  ;;  %2591 = vmatmul.mubr.msk.f32.gmra.mrb[148].mxu1 %vm299_vm4, %v100_v52  ;;  %2698 = vmatmul.mubr.f32.gmra.mrb[26].mxu0 %v1093_v53  ;;  %v2433_v56 = vpop.f32.mrb[43].mxu1 }
 0x205   :  { %2593 = vmatprep.mubr.msk.f32.mxu1 %vm3080_vm0, %v3081_v4  ;;  %2700 = vmatprep.mubr.msk.f32.mxu0 %vm3080_vm0, %v3081_v4 }
 0x206   :  { %v1094_v58 = vmax.f32 %v677_v54, %v1015_v55 }
 0x207   :  { %v682_v59 = vpop.f32.mrb[44].mxu1 }
 0x208   :  { %v1016_v60 = vmul.f32 0.01, %v682_v59  ;;  %2594 = vmatmul.mubr.msk.f32.gmra.mrb[150].mxu1 %vm299_vm4, %v101_v57  ;;  %2701 = vmatmul.mubr.f32.gmra.mrb[28].mxu0 %v1094_v58  ;;  %v2436_v61 = vpop.f32.mrb[45].mxu1 }
 0x209   :  { %2596 = vmatprep.mubr.msk.f32.mxu1 %vm3080_vm0, %v3081_v4  ;;  %2703 = vmatprep.mubr.msk.f32.mxu0 %vm3080_vm0, %v3081_v4 }
 0x20a   :  { %v1095_v63 = vmax.f32 %v682_v59, %v1016_v60 }
 0x20b   :  { %v687_v0 = vpop.f32.mrb[46].mxu1 }
 0x20c   :  { %v1017_v1 = vmul.f32 0.01, %v687_v0  ;;  %2597 = vmatmul.mubr.msk.f32.gmra.mrb[152].mxu1 %vm299_vm4, %v102_v62  ;;  %2704 = vmatmul.mubr.f32.gmra.mrb[30].mxu0 %v1095_v63  ;;  %v2439_v3 = vpop.f32.mrb[47].mxu1 }
 0x20d   :  { %2599 = vmatprep.mubr.msk.f32.mxu1 %vm3080_vm0, %v3081_v4  ;;  %2706 = vmatprep.mubr.msk.f32.mxu0 %vm3080_vm0, %v3081_v4 }
 0x20e   :  { %v1096_v6 = vmax.f32 %v687_v0, %v1017_v1 }
 0x20f   :  { %v692_v7 = vpop.f32.mrb[48].mxu1 }
 0x210   :  { %v1018_v8 = vmul.f32 0.01, %v692_v7  ;;  %2600 = vmatmul.mubr.msk.f32.gmra.mrb[154].mxu1 %vm299_vm4, %v103_v5  ;;  %2707 = vmatmul.mubr.f32.gmra.mrb[32].mxu0 %v1096_v6  ;;  %v2442_v9 = vpop.f32.mrb[49].mxu1  ;;  %v132_v5 = vld [vmem:[%s4107_s5] sm:$0xff]  ;;  %v133_v6 = vld [vmem:[%s4107_s5 + $0x8] sm:$0xff] }
 0x211   :  { %2602 = vmatprep.mubr.msk.f32.mxu1 %vm3080_vm0, %v3081_v4  ;;  %2709 = vmatprep.mubr.msk.f32.mxu0 %vm3080_vm0, %v3081_v4 }
 0x212   :  { %v1097_v11 = vmax.f32 %v692_v7, %v1018_v8  ;;  %v3002_v8 = vpack.c.bf16 %v133_v6, %v132_v5 }
 0x213   :  { %v697_v12 = vpop.f32.mrb[50].mxu1 }
 0x214   :  { %v1019_v13 = vmul.f32 0.01, %v697_v12  ;;  %2603 = vmatmul.mubr.msk.f32.gmra.mrb[156].mxu1 %vm299_vm4, %v104_v10  ;;  %2710 = vmatmul.mubr.f32.gmra.mrb[34].mxu0 %v1097_v11  ;;  %v2445_v14 = vpop.f32.mrb[51].mxu1 }
 0x215   :  { %2605 = vmatprep.mubr.msk.f32.mxu1 %vm3080_vm0, %v3081_v4  ;;  %2712 = vmatprep.mubr.msk.f32.mxu0 %vm3080_vm0, %v3081_v4 }
 0x216   :  { %v1098_v16 = vmax.f32 %v697_v12, %v1019_v13  ;;  %3003 = vmatpush3.bf16.msra.mxu1 %v3002_v8 }
 0x217   :  { %v702_v17 = vpop.f32.mrb[52].mxu1  ;;  %3004 = vmatprep.subr.bf16.mxu1 %v3079_v2 }
 0x218   :  { %v1020_v18 = vmul.f32 0.01, %v702_v17  ;;  %2606 = vmatmul.mubr.msk.f32.gmra.mrb[158].mxu1 %vm299_vm4, %v105_v15  ;;  %2713 = vmatmul.mubr.f32.gmra.mrb[36].mxu0 %v1098_v16  ;;  %v2448_v19 = vpop.f32.mrb[53].mxu1 }
 0x219   :  { %2608 = vmatprep.mubr.msk.f32.mxu1 %vm3080_vm0, %v3081_v4  ;;  %2715 = vmatprep.mubr.msk.f32.mxu0 %vm3080_vm0, %v3081_v4 }
 0x21a   :  { %v1099_v21 = vmax.f32 %v702_v17, %v1020_v18 }
 0x21b   :  { %v707_v22 = vpop.f32.mrb[54].mxu1 }
 0x21c   :  { %v1021_v23 = vmul.f32 0.01, %v707_v22  ;;  %2609 = vmatmul.mubr.msk.f32.gmra.mrb[160].mxu1 %vm299_vm4, %v106_v20  ;;  %2716 = vmatmul.mubr.f32.gmra.mrb[38].mxu0 %v1099_v21  ;;  %v2451_v24 = vpop.f32.mrb[55].mxu1 }
 0x21d   :  { %2611 = vmatprep.mubr.msk.f32.mxu1 %vm3080_vm0, %v3081_v4  ;;  %2718 = vmatprep.mubr.msk.f32.mxu0 %vm3080_vm0, %v3081_v4 }
 0x21e   :  { %v1100_v26 = vmax.f32 %v707_v22, %v1021_v23 }
 0x21f   :  { %v712_v27 = vpop.f32.mrb[56].mxu1 }
 0x220   :  { %v1022_v28 = vmul.f32 0.01, %v712_v27  ;;  %2612 = vmatmul.mubr.msk.f32.gmra.mrb[162].mxu1 %vm299_vm4, %v107_v25  ;;  %2719 = vmatmul.mubr.f32.gmra.mrb[40].mxu0 %v1100_v26  ;;  %v2454_v29 = vpop.f32.mrb[57].mxu1 }
 0x221   :  { %2614 = vmatprep.mubr.msk.f32.mxu1 %vm3080_vm0, %v3081_v4  ;;  %2721 = vmatprep.mubr.msk.f32.mxu0 %vm3080_vm0, %v3081_v4 }
 0x222   :  { %v1101_v31 = vmax.f32 %v712_v27, %v1022_v28 }
 0x223   :  { %v717_v32 = vpop.f32.mrb[58].mxu1 }
 0x224   :  { %v1023_v33 = vmul.f32 0.01, %v717_v32  ;;  %2615 = vmatmul.mubr.msk.f32.gmra.mrb[164].mxu1 %vm299_vm4, %v108_v30  ;;  %2722 = vmatmul.mubr.f32.gmra.mrb[42].mxu0 %v1101_v31  ;;  %v2457_v34 = vpop.f32.mrb[59].mxu1 }
 0x225   :  { %2617 = vmatprep.mubr.msk.f32.mxu1 %vm3080_vm0, %v3081_v4  ;;  %2724 = vmatprep.mubr.msk.f32.mxu0 %vm3080_vm0, %v3081_v4 }
 0x226   :  { %v1102_v36 = vmax.f32 %v717_v32, %v1023_v33 }
 0x227   :  { %v722_v37 = vpop.f32.mrb[60].mxu1 }
 0x228   :  { %v1024_v38 = vmul.f32 0.01, %v722_v37  ;;  %2618 = vmatmul.mubr.msk.f32.gmra.mrb[166].mxu1 %vm299_vm4, %v109_v35  ;;  %2725 = vmatmul.mubr.f32.gmra.mrb[44].mxu0 %v1102_v36  ;;  %v2460_v39 = vpop.f32.mrb[61].mxu1 }
 0x229   :  { %2620 = vmatprep.mubr.msk.f32.mxu1 %vm3080_vm0, %v3081_v4  ;;  %2727 = vmatprep.mubr.msk.f32.mxu0 %vm3080_vm0, %v3081_v4 }
 0x22a   :  { %v1103_v41 = vmax.f32 %v722_v37, %v1024_v38 }
 0x22b   :  { %v727_v42 = vpop.f32.mrb[62].mxu1 }
 0x22c   :  { %v1025_v43 = vmul.f32 0.01, %v727_v42  ;;  %2621 = vmatmul.mubr.msk.f32.gmra.mrb[168].mxu1 %vm299_vm4, %v110_v40  ;;  %2728 = vmatmul.mubr.f32.gmra.mrb[46].mxu0 %v1103_v41  ;;  %v2463_v44 = vpop.f32.mrb[63].mxu1 }
 0x22d   :  { %2623 = vmatprep.mubr.msk.f32.mxu1 %vm3080_vm0, %v3081_v4  ;;  %2730 = vmatprep.mubr.msk.f32.mxu0 %vm3080_vm0, %v3081_v4 }
 0x22e   :  { %v1104_v46 = vmax.f32 %v727_v42, %v1025_v43 }
 0x22f   :  { %v732_v47 = vpop.f32.mrb[64].mxu1 }
 0x230   :  { %v1026_v48 = vmul.f32 0.01, %v732_v47  ;;  %2624 = vmatmul.mubr.msk.f32.gmra.mrb[170].mxu1 %vm299_vm4, %v111_v45  ;;  %2731 = vmatmul.mubr.f32.gmra.mrb[48].mxu0 %v1104_v46  ;;  %v2466_v49 = vpop.f32.mrb[65].mxu1 }
 0x231   :  { %2733 = vmatprep.mubr.msk.f32.mxu0 %vm3080_vm0, %v3081_v4  ;;  %2927 = vmatprep.mubr.msk.f32.mxu1 %vm3080_vm0, %v3081_v4  ;;  %v135_v49 = vld [vmem:[%s4107_s5 + $0x18] sm:$0xff] }
 0x232   :  { %v1105_v50 = vmax.f32 %v732_v47, %v1026_v48  ;;  %v134_v48 = vld [vmem:[%s4107_s5 + $0x10] sm:$0xff] }
 0x233   :  { %v737_v51 = vpop.f32.mrb[66].mxu1 }
 0x234   :  { %v1027_v52 = vmul.f32 0.01, %v737_v51  ;;  %2734 = vmatmul.mubr.f32.gmra.mrb[50].mxu0 %v1105_v50  ;;  %v2469_v53 = vpop.f32.mrb[67].mxu1 }
 0x235   :  { %2736 = vmatprep.mubr.msk.f32.mxu0 %vm3080_vm0, %v3081_v4 }
 0x236   :  { %v1106_v54 = vmax.f32 %v737_v51, %v1027_v52  ;;  %v3005_v51 = vpack.c.bf16 %v135_v49, %v134_v48 }
 0x237   :  { %v742_v55 = vpop.f32.mrb[68].mxu1 }
 0x238   :  { %v1028_v56 = vmul.f32 0.01, %v742_v55  ;;  %2737 = vmatmul.mubr.f32.gmra.mrb[52].mxu0 %v1106_v54  ;;  %v2472_v57 = vpop.f32.mrb[69].mxu1  ;;  %3006 = vmatpush3.bf16.msra.mxu1 %v3005_v51 }
 0x239   :  { %2739 = vmatprep.mubr.msk.f32.mxu0 %vm3080_vm0, %v3081_v4  ;;  %3007 = vmatprep.subr.bf16.mxu1 %v3079_v2 }
 0x23a   :  { %v1107_v58 = vmax.f32 %v742_v55, %v1028_v56 }
 0x23b   :  { %v747_v59 = vpop.f32.mrb[70].mxu1 }
 0x23c   :  { %v1029_v60 = vmul.f32 0.01, %v747_v59  ;;  %2740 = vmatmul.mubr.f32.gmra.mrb[54].mxu0 %v1107_v58  ;;  %v2475_v61 = vpop.f32.mrb[71].mxu1 }
 0x23d   :  { %2742 = vmatprep.mubr.msk.f32.mxu0 %vm3080_vm0, %v3081_v4 }
 0x23e   :  { %v1108_v62 = vmax.f32 %v747_v59, %v1029_v60 }
 0x23f   :  { %v752_v63 = vpop.f32.mrb[72].mxu1 }
 0x240   :  { %v1030_v0 = vmul.f32 0.01, %v752_v63  ;;  %2743 = vmatmul.mubr.f32.gmra.mrb[56].mxu0 %v1108_v62  ;;  %v2478_v1 = vpop.f32.mrb[73].mxu1 }
 0x241   :  { %2745 = vmatprep.mubr.msk.f32.mxu0 %vm3080_vm0, %v3081_v4 }
 0x242   :  { %v1109_v3 = vmax.f32 %v752_v63, %v1030_v0 }
 0x243   :  { %v757_v7 = vpop.f32.mrb[74].mxu1 }
 0x244   :  { %v1031_v9 = vmul.f32 0.01, %v757_v7  ;;  %2746 = vmatmul.mubr.f32.gmra.mrb[58].mxu0 %v1109_v3  ;;  %v2481_v10 = vpop.f32.mrb[75].mxu1 }
 0x245   :  { %2748 = vmatprep.mubr.msk.f32.mxu0 %vm3080_vm0, %v3081_v4 }
 0x246   :  { %v1110_v11 = vmax.f32 %v757_v7, %v1031_v9 }
 0x247   :  { %v762_v12 = vpop.f32.mrb[76].mxu1 }
 0x248   :  { %v1032_v13 = vmul.f32 0.01, %v762_v12  ;;  %2749 = vmatmul.mubr.f32.gmra.mrb[60].mxu0 %v1110_v11  ;;  %v2484_v14 = vpop.f32.mrb[77].mxu1 }
 0x249   :  { %2751 = vmatprep.mubr.msk.f32.mxu0 %vm3080_vm0, %v3081_v4 }
 0x24a   :  { %v1111_v15 = vmax.f32 %v762_v12, %v1032_v13 }
 0x24b   :  { %v767_v16 = vpop.f32.mrb[78].mxu1 }
 0x24c   :  { %v1033_v17 = vmul.f32 0.01, %v767_v16  ;;  %2752 = vmatmul.mubr.f32.gmra.mrb[62].mxu0 %v1111_v15  ;;  %v2487_v18 = vpop.f32.mrb[79].mxu1 }
 0x24d   :  { %2754 = vmatprep.mubr.msk.f32.mxu0 %vm3080_vm0, %v3081_v4 }
 0x24e   :  { %v1112_v19 = vmax.f32 %v767_v16, %v1033_v17 }
 0x24f   :  { %v772_v20 = vpop.f32.mrb[80].mxu1 }
 0x250   :  { %v1034_v21 = vmul.f32 0.01, %v772_v20  ;;  %2755 = vmatmul.mubr.f32.gmra.mrb[64].mxu0 %v1112_v19  ;;  %v2490_v22 = vpop.f32.mrb[81].mxu1 }
 0x251   :  { %2757 = vmatprep.mubr.msk.f32.mxu0 %vm3080_vm0, %v3081_v4 }
 0x252   :  { %v1113_v23 = vmax.f32 %v772_v20, %v1034_v21 }
 0x253   :  { %v777_v24 = vpop.f32.mrb[82].mxu1 }
 0x254   :  { %v1035_v25 = vmul.f32 0.01, %v777_v24  ;;  %2758 = vmatmul.mubr.f32.gmra.mrb[66].mxu0 %v1113_v23  ;;  %v2493_v26 = vpop.f32.mrb[83].mxu1 }
 0x255   :  { %2760 = vmatprep.mubr.msk.f32.mxu0 %vm3080_vm0, %v3081_v4 }
 0x256   :  { %v1114_v27 = vmax.f32 %v777_v24, %v1035_v25 }
 0x257   :  { %v782_v28 = vpop.f32.mrb[84].mxu1 }
 0x258   :  { %v1036_v29 = vmul.f32 0.01, %v782_v28  ;;  %2761 = vmatmul.mubr.f32.gmra.mrb[68].mxu0 %v1114_v27  ;;  %v2496_v30 = vpop.f32.mrb[85].mxu1 }
 0x259   :  { %2763 = vmatprep.mubr.msk.f32.mxu0 %vm3080_vm0, %v3081_v4  ;;  %v137_v30 = vld [vmem:[%s4107_s5 + $0x28] sm:$0xff] }
 0x25a   :  { %v1115_v31 = vmax.f32 %v782_v28, %v1036_v29  ;;  %v136_v29 = vld [vmem:[%s4107_s5 + $0x20] sm:$0xff] }
 0x25b   :  { %v787_v32 = vpop.f32.mrb[86].mxu1 }
 0x25c   :  { %v1037_v33 = vmul.f32 0.01, %v787_v32  ;;  %2764 = vmatmul.mubr.f32.gmra.mrb[70].mxu0 %v1115_v31  ;;  %v2499_v34 = vpop.f32.mrb[87].mxu1 }
 0x25d   :  { %2766 = vmatprep.mubr.msk.f32.mxu0 %vm3080_vm0, %v3081_v4 }
 0x25e   :  { %v1116_v35 = vmax.f32 %v787_v32, %v1037_v33  ;;  %v3008_v32 = vpack.c.bf16 %v137_v30, %v136_v29 }
 0x25f   :  { %v792_v36 = vpop.f32.mrb[88].mxu1 }
 0x260   :  { %v1038_v37 = vmul.f32 0.01, %v792_v36  ;;  %2767 = vmatmul.mubr.f32.gmra.mrb[72].mxu0 %v1116_v35  ;;  %v2502_v38 = vpop.f32.mrb[89].mxu1  ;;  %3009 = vmatpush3.bf16.msra.mxu1 %v3008_v32 }
 0x261   :  { %2769 = vmatprep.mubr.msk.f32.mxu0 %vm3080_vm0, %v3081_v4  ;;  %3010 = vmatprep.subr.bf16.mxu1 %v3079_v2 }
 0x262   :  { %v1117_v39 = vmax.f32 %v792_v36, %v1038_v37 }
 0x263   :  { %v797_v40 = vpop.f32.mrb[90].mxu1 }
 0x264   :  { %v1039_v41 = vmul.f32 0.01, %v797_v40  ;;  %2770 = vmatmul.mubr.f32.gmra.mrb[74].mxu0 %v1117_v39  ;;  %v2505_v42 = vpop.f32.mrb[91].mxu1 }
 0x265   :  { %2772 = vmatprep.mubr.msk.f32.mxu0 %vm3080_vm0, %v3081_v4 }
 0x266   :  { %v1118_v43 = vmax.f32 %v797_v40, %v1039_v41 }
 0x267   :  { %v802_v44 = vpop.f32.mrb[92].mxu1 }
 0x268   :  { %v1040_v45 = vmul.f32 0.01, %v802_v44  ;;  %2773 = vmatmul.mubr.f32.gmra.mrb[76].mxu0 %v1118_v43  ;;  %v2508_v46 = vpop.f32.mrb[93].mxu1 }
 0x269   :  { %2775 = vmatprep.mubr.msk.f32.mxu0 %vm3080_vm0, %v3081_v4 }
 0x26a   :  { %v1119_v47 = vmax.f32 %v802_v44, %v1040_v45 }
 0x26b   :  { %v807_v50 = vpop.f32.mrb[94].mxu1 }
 0x26c   :  { %v1041_v52 = vmul.f32 0.01, %v807_v50  ;;  %2776 = vmatmul.mubr.f32.gmra.mrb[78].mxu0 %v1119_v47  ;;  %v2511_v53 = vpop.f32.mrb[95].mxu1  ;;  %v3857_v47 = vld [vmem:[%s4106_s4] ss:$0 sm:$0xff] }
 0x26d   :  { %2778 = vmatprep.mubr.msk.f32.mxu0 %vm3080_vm0, %v3081_v4 }
 0x26e   :  { %v1120_v54 = vmax.f32 %v807_v50, %v1041_v52 }
 0x26f   :  { %v812_v55 = vpop.f32.mrb[96].mxu1 }
 0x270   :  { %v1042_v56 = vmul.f32 0.01, %v812_v55  ;;  %2779 = vmatmul.mubr.f32.gmra.mrb[80].mxu0 %v1120_v54  ;;  %v2514_v57 = vpop.f32.mrb[97].mxu1 }
 0x271   :  { %2781 = vmatprep.mubr.msk.f32.mxu0 %vm3080_vm0, %v3081_v4 }
 0x272   :  { %v1121_v58 = vmax.f32 %v812_v55, %v1042_v56 }
 0x273   :  { %v817_v59 = vpop.f32.mrb[98].mxu1 }
 0x274   :  { %v1043_v60 = vmul.f32 0.01, %v817_v59  ;;  %2782 = vmatmul.mubr.f32.gmra.mrb[82].mxu0 %v1121_v58  ;;  %v2517_v61 = vpop.f32.mrb[99].mxu1 }
 0x275   :  { %2784 = vmatprep.mubr.msk.f32.mxu0 %vm3080_vm0, %v3081_v4 }
 0x276   :  { %v1122_v62 = vmax.f32 %v817_v59, %v1043_v60 }
 0x277   :  { %v822_v63 = vpop.f32.mrb[100].mxu1 }
 0x278   :  { %v1044_v0 = vmul.f32 0.01, %v822_v63  ;;  %2785 = vmatmul.mubr.f32.gmra.mrb[84].mxu0 %v1122_v62  ;;  %v2520_v1 = vpop.f32.mrb[101].mxu1 }
 0x279   :  { %2787 = vmatprep.mubr.msk.f32.mxu0 %vm3080_vm0, %v3081_v4 }
 0x27a   :  { %v1123_v3 = vmax.f32 %v822_v63, %v1044_v0 }
 0x27b   :  { %v827_v5 = vpop.f32.mrb[102].mxu1 }
 0x27c   :  { %v1045_v6 = vmul.f32 0.01, %v827_v5  ;;  %2788 = vmatmul.mubr.f32.gmra.mrb[86].mxu0 %v1123_v3  ;;  %v2523_v7 = vpop.f32.mrb[103].mxu1 }
 0x27d   :  { %2790 = vmatprep.mubr.msk.f32.mxu0 %vm3080_vm0, %v3081_v4 }
 0x27e   :  { %v1124_v8 = vmax.f32 %v827_v5, %v1045_v6 }
 0x27f   :  { %v832_v9 = vpop.f32.mrb[104].mxu1 }
 0x280   :  { %v1046_v10 = vmul.f32 0.01, %v832_v9  ;;  %2791 = vmatmul.mubr.f32.gmra.mrb[88].mxu0 %v1124_v8  ;;  %v2526_v11 = vpop.f32.mrb[105].mxu1 }
 0x281   :  { %2793 = vmatprep.mubr.msk.f32.mxu0 %vm3080_vm0, %v3081_v4 }
 0x282   :  { %v1125_v12 = vmax.f32 %v832_v9, %v1046_v10 }
 0x283   :  { %v837_v13 = vpop.f32.mrb[106].mxu1 }
 0x284   :  { %v1047_v14 = vmul.f32 0.01, %v837_v13  ;;  %2794 = vmatmul.mubr.f32.gmra.mrb[90].mxu0 %v1125_v12  ;;  %v2529_v15 = vpop.f32.mrb[107].mxu1 }
 0x285   :  { %2796 = vmatprep.mubr.msk.f32.mxu0 %vm3080_vm0, %v3081_v4 }
 0x286   :  { %v1126_v16 = vmax.f32 %v837_v13, %v1047_v14 }
 0x287   :  { %v842_v17 = vpop.f32.mrb[108].mxu1 }
 0x288   :  { %v1048_v18 = vmul.f32 0.01, %v842_v17  ;;  %2797 = vmatmul.mubr.f32.gmra.mrb[92].mxu0 %v1126_v16  ;;  %v2532_v19 = vpop.f32.mrb[109].mxu1 }
 0x289   :  { %2799 = vmatprep.mubr.msk.f32.mxu0 %vm3080_vm0, %v3081_v4 }
 0x28a   :  { %v1127_v20 = vmax.f32 %v842_v17, %v1048_v18 }
 0x28b   :  { %v847_v21 = vpop.f32.mrb[110].mxu1 }
 0x28c   :  { %v1049_v22 = vmul.f32 0.01, %v847_v21  ;;  %2800 = vmatmul.mubr.f32.gmra.mrb[94].mxu0 %v1127_v20  ;;  %v2535_v23 = vpop.f32.mrb[111].mxu1 }
 0x28d   :  { %2802 = vmatprep.mubr.msk.f32.mxu0 %vm3080_vm0, %v3081_v4 }
 0x28e   :  { %v1128_v24 = vmax.f32 %v847_v21, %v1049_v22 }
 0x28f   :  { %v852_v25 = vpop.f32.mrb[112].mxu1 }
 0x290   :  { %v1050_v26 = vmul.f32 0.01, %v852_v25  ;;  %2803 = vmatmul.mubr.f32.gmra.mrb[96].mxu0 %v1128_v24  ;;  %v2538_v27 = vpop.f32.mrb[113].mxu1 }
 0x291   :  { %2805 = vmatprep.mubr.msk.f32.mxu0 %vm3080_vm0, %v3081_v4 }
 0x292   :  { %v1129_v28 = vmax.f32 %v852_v25, %v1050_v26 }
 0x293   :  { %v857_v31 = vpop.f32.mrb[114].mxu1 }
 0x294   :  { %v1051_v33 = vmul.f32 0.01, %v857_v31  ;;  %2806 = vmatmul.mubr.f32.gmra.mrb[98].mxu0 %v1129_v28  ;;  %v2541_v34 = vpop.f32.mrb[115].mxu1 }
 0x295   :  { %2808 = vmatprep.mubr.msk.f32.mxu0 %vm3080_vm0, %v3081_v4 }
 0x296   :  { %v1130_v35 = vmax.f32 %v857_v31, %v1051_v33 }
 0x297   :  { %v862_v36 = vpop.f32.mrb[116].mxu1 }
 0x298   :  { %v1052_v37 = vmul.f32 0.01, %v862_v36  ;;  %2809 = vmatmul.mubr.f32.gmra.mrb[100].mxu0 %v1130_v35  ;;  %v2544_v38 = vpop.f32.mrb[117].mxu1 }
 0x299   :  { %2811 = vmatprep.mubr.msk.f32.mxu0 %vm3080_vm0, %v3081_v4 }
 0x29a   :  { %v1131_v39 = vmax.f32 %v862_v36, %v1052_v37 }
 0x29b   :  { %v867_v40 = vpop.f32.mrb[118].mxu1 }
 0x29c   :  { %v1053_v41 = vmul.f32 0.01, %v867_v40  ;;  %2812 = vmatmul.mubr.f32.gmra.mrb[102].mxu0 %v1131_v39  ;;  %v2547_v42 = vpop.f32.mrb[119].mxu1 }
 0x29d   :  { %2814 = vmatprep.mubr.msk.f32.mxu0 %vm3080_vm0, %v3081_v4 }
 0x29e   :  { %v1132_v43 = vmax.f32 %v867_v40, %v1053_v41 }
 0x29f   :  { %v872_v44 = vpop.f32.mrb[120].mxu1 }
 0x2a0   :  { %v1054_v45 = vmul.f32 0.01, %v872_v44  ;;  %2815 = vmatmul.mubr.f32.gmra.mrb[104].mxu0 %v1132_v43  ;;  %v2550_v46 = vpop.f32.mrb[121].mxu1 }
 0x2a1   :  { %2817 = vmatprep.mubr.msk.f32.mxu0 %vm3080_vm0, %v3081_v4 }
 0x2a2   :  { %v1133_v48 = vmax.f32 %v872_v44, %v1054_v45  ;;  %v138_v44 = vld [vmem:[%s4107_s5 + $0x30] sm:$0xff]  ;;  %v139_v45 = vld [vmem:[%s4107_s5 + $0x38] sm:$0xff] }
 0x2a3   :  { %v877_v49 = vpop.f32.mrb[122].mxu1  ;;  %v1231_v50 = vpop.f32.mrb[0].mxu0 }
 0x2a4   :  { %v1055_v51 = vmul.f32 0.01, %v877_v49  ;;  %2818 = vmatmul.mubr.f32.gmra.mrb[106].mxu0 %v1133_v48  ;;  %v2553_v52 = vpop.f32.mrb[123].mxu1  ;;  %v1232_v53 = vadd.f32 %v3857_v47, %v1231_v50  ;;  %v2660_v54 = vpop.f32.mrb[1].mxu0 }
 0x2a5   :  { %2820 = vmatprep.mubr.msk.f32.mxu0 %vm3080_vm0, %v3081_v4 }
 0x2a6   :  { %v1134_v55 = vmax.f32 %v877_v49, %v1055_v51  ;;  %v1625_v58 = vmul.f32 0.01, %v1232_v53  ;;  %v3011_v49 = vpack.c.bf16 %v139_v45, %v138_v44 }
 0x2a7   :  { %v882_v56 = vpop.f32.mrb[124].mxu1  ;;  %v1236_v57 = vpop.f32.mrb[2].mxu0 }
 0x2a8   :  { %v1056_v59 = vmul.f32 0.01, %v882_v56  ;;  %v1237_v60 = vadd.f32 %v3857_v47, %v1236_v57  ;;  %2821 = vmatmul.mubr.f32.gmra.mrb[108].mxu0 %v1134_v55  ;;  %v2556_v61 = vpop.f32.mrb[125].mxu1  ;;  %v2663_v62 = vpop.f32.mrb[3].mxu0  ;;  %v1704_v5 = vmax.f32 %v1232_v53, %v1625_v58  ;;  %3012 = vmatpush3.bf16.msra.mxu1 %v3011_v49 }
 0x2a9   :  { %2823 = vmatprep.mubr.msk.f32.mxu0 %vm3080_vm0, %v3081_v4  ;;  %3013 = vmatprep.subr.bf16.mxu1 %v3079_v2 }
 0x2aa   :  { %v1135_v63 = vmax.f32 %v882_v56, %v1056_v59  ;;  %v1626_v0 = vmul.f32 0.01, %v1237_v60 }
 0x2ab   :  { %v887_v1 = vpop.f32.mrb[126].mxu1  ;;  %v1241_v3 = vpop.f32.mrb[4].mxu0 }
 0x2ac   :  { %v1705_v6 = vmax.f32 %v1237_v60, %v1626_v0  ;;  %v1057_v7 = vmul.f32 0.01, %v887_v1  ;;  %v1242_v8 = vadd.f32 %v3857_v47, %v1241_v3  ;;  %2824 = vmatmul.mubr.f32.gmra.mrb[110].mxu0 %v1135_v63  ;;  %v2559_v9 = vpop.f32.mrb[127].mxu1  ;;  %v2666_v10 = vpop.f32.mrb[5].mxu0 }
 0x2ad   :  { %2826 = vmatprep.mubr.msk.f32.mxu0 %vm3080_vm0, %v3081_v4 }
 0x2ae   :  { %v1783_v11 = vadd.f32 %v1705_v6, %v1704_v5  ;;  %v1136_v12 = vmax.f32 %v887_v1, %v1057_v7  ;;  %v1627_v13 = vmul.f32 0.01, %v1242_v8 }
 0x2af   :  { %v892_v14 = vpop.f32.mrb[128].mxu1  ;;  %v1246_v15 = vpop.f32.mrb[6].mxu0 }
 0x2b0   :  { %v1706_v16 = vmax.f32 %v1242_v8, %v1627_v13  ;;  %v1058_v17 = vmul.f32 0.01, %v892_v14  ;;  %v1247_v18 = vadd.f32 %v3857_v47, %v1246_v15  ;;  %2827 = vmatmul.mubr.f32.gmra.mrb[112].mxu0 %v1136_v12  ;;  %v2562_v19 = vpop.f32.mrb[129].mxu1  ;;  %v2669_v20 = vpop.f32.mrb[7].mxu0 }
 0x2b1   :  { %2829 = vmatprep.mubr.msk.f32.mxu0 %vm3080_vm0, %v3081_v4 }
 0x2b2   :  { %v1784_v21 = vadd.f32 %v1783_v11, %v1706_v16  ;;  %v1137_v22 = vmax.f32 %v892_v14, %v1058_v17  ;;  %v1628_v23 = vmul.f32 0.01, %v1247_v18 }
 0x2b3   :  { %v897_v24 = vpop.f32.mrb[130].mxu1  ;;  %v1251_v25 = vpop.f32.mrb[8].mxu0 }
 0x2b4   :  { %v1707_v26 = vmax.f32 %v1247_v18, %v1628_v23  ;;  %v1059_v27 = vmul.f32 0.01, %v897_v24  ;;  %v1252_v28 = vadd.f32 %v3857_v47, %v1251_v25  ;;  %2830 = vmatmul.mubr.f32.gmra.mrb[114].mxu0 %v1137_v22  ;;  %v2565_v29 = vpop.f32.mrb[131].mxu1  ;;  %v2672_v30 = vpop.f32.mrb[9].mxu0 }
 0x2b5   :  { %2832 = vmatprep.mubr.msk.f32.mxu0 %vm3080_vm0, %v3081_v4 }
 0x2b6   :  { %v1785_v31 = vadd.f32 %v1784_v21, %v1707_v26  ;;  %v1138_v32 = vmax.f32 %v897_v24, %v1059_v27  ;;  %v1629_v33 = vmul.f32 0.01, %v1252_v28 }
 0x2b7   :  { %v902_v34 = vpop.f32.mrb[132].mxu1  ;;  %v1256_v35 = vpop.f32.mrb[10].mxu0 }
 0x2b8   :  { %v1708_v36 = vmax.f32 %v1252_v28, %v1629_v33  ;;  %v1060_v37 = vmul.f32 0.01, %v902_v34  ;;  %v1257_v38 = vadd.f32 %v3857_v47, %v1256_v35  ;;  %2833 = vmatmul.mubr.f32.gmra.mrb[116].mxu0 %v1138_v32  ;;  %v2568_v39 = vpop.f32.mrb[133].mxu1  ;;  %v2675_v40 = vpop.f32.mrb[11].mxu0 }
 0x2b9   :  { %2835 = vmatprep.mubr.msk.f32.mxu0 %vm3080_vm0, %v3081_v4 }
 0x2ba   :  { %v1786_v41 = vadd.f32 %v1785_v31, %v1708_v36  ;;  %v1139_v42 = vmax.f32 %v902_v34, %v1060_v37  ;;  %v1630_v43 = vmul.f32 0.01, %v1257_v38 }
 0x2bb   :  { %v907_v46 = vpop.f32.mrb[134].mxu1  ;;  %v1261_v48 = vpop.f32.mrb[12].mxu0 }
 0x2bc   :  { %v1709_v50 = vmax.f32 %v1257_v38, %v1630_v43  ;;  %v1061_v51 = vmul.f32 0.01, %v907_v46  ;;  %v1262_v52 = vadd.f32 %v3857_v47, %v1261_v48  ;;  %2836 = vmatmul.mubr.f32.gmra.mrb[118].mxu0 %v1139_v42  ;;  %v2571_v53 = vpop.f32.mrb[135].mxu1  ;;  %v2678_v54 = vpop.f32.mrb[13].mxu0 }
 0x2bd   :  { %2838 = vmatprep.mubr.msk.f32.mxu0 %vm3080_vm0, %v3081_v4 }
 0x2be   :  { %v1787_v55 = vadd.f32 %v1786_v41, %v1709_v50  ;;  %v1140_v56 = vmax.f32 %v907_v46, %v1061_v51  ;;  %v1631_v57 = vmul.f32 0.01, %v1262_v52 }
 0x2bf   :  { %v912_v58 = vpop.f32.mrb[136].mxu1  ;;  %v1266_v59 = vpop.f32.mrb[14].mxu0 }
 0x2c0   :  { %v1710_v60 = vmax.f32 %v1262_v52, %v1631_v57  ;;  %v1062_v61 = vmul.f32 0.01, %v912_v58  ;;  %v1267_v62 = vadd.f32 %v3857_v47, %v1266_v59  ;;  %2839 = vmatmul.mubr.f32.gmra.mrb[120].mxu0 %v1140_v56  ;;  %v2574_v63 = vpop.f32.mrb[137].mxu1  ;;  %v2681_v0 = vpop.f32.mrb[15].mxu0 }
 0x2c1   :  { %2841 = vmatprep.mubr.msk.f32.mxu0 %vm3080_vm0, %v3081_v4 }
 0x2c2   :  { %v1788_v1 = vadd.f32 %v1787_v55, %v1710_v60  ;;  %v1141_v3 = vmax.f32 %v912_v58, %v1062_v61  ;;  %v1632_v5 = vmul.f32 0.01, %v1267_v62 }
 0x2c3   :  { %v917_v6 = vpop.f32.mrb[138].mxu1  ;;  %v1271_v7 = vpop.f32.mrb[16].mxu0 }
 0x2c4   :  { %v1711_v8 = vmax.f32 %v1267_v62, %v1632_v5  ;;  %v1063_v9 = vmul.f32 0.01, %v917_v6  ;;  %v1272_v10 = vadd.f32 %v3857_v47, %v1271_v7  ;;  %2842 = vmatmul.mubr.f32.gmra.mrb[122].mxu0 %v1141_v3  ;;  %v2577_v11 = vpop.f32.mrb[139].mxu1  ;;  %v2684_v12 = vpop.f32.mrb[17].mxu0 }
 0x2c5   :  { %2844 = vmatprep.mubr.msk.f32.mxu0 %vm3080_vm0, %v3081_v4 }
 0x2c6   :  { %v1789_v13 = vadd.f32 %v1788_v1, %v1711_v8  ;;  %v1142_v14 = vmax.f32 %v917_v6, %v1063_v9  ;;  %v1633_v15 = vmul.f32 0.01, %v1272_v10 }
 0x2c7   :  { %v922_v16 = vpop.f32.mrb[140].mxu1  ;;  %v1276_v17 = vpop.f32.mrb[18].mxu0 }
 0x2c8   :  { %v1712_v18 = vmax.f32 %v1272_v10, %v1633_v15  ;;  %v1064_v19 = vmul.f32 0.01, %v922_v16  ;;  %v1277_v20 = vadd.f32 %v3857_v47, %v1276_v17  ;;  %2845 = vmatmul.mubr.f32.gmra.mrb[124].mxu0 %v1142_v14  ;;  %v2580_v21 = vpop.f32.mrb[141].mxu1  ;;  %v2687_v22 = vpop.f32.mrb[19].mxu0 }
 0x2c9   :  { %2847 = vmatprep.mubr.msk.f32.mxu0 %vm3080_vm0, %v3081_v4 }
 0x2ca   :  { %v1790_v23 = vadd.f32 %v1789_v13, %v1712_v18  ;;  %v1143_v24 = vmax.f32 %v922_v16, %v1064_v19  ;;  %v1634_v25 = vmul.f32 0.01, %v1277_v20 }
 0x2cb   :  { %v927_v26 = vpop.f32.mrb[142].mxu1  ;;  %v1281_v27 = vpop.f32.mrb[20].mxu0 }
 0x2cc   :  { %v1713_v28 = vmax.f32 %v1277_v20, %v1634_v25  ;;  %v1065_v29 = vmul.f32 0.01, %v927_v26  ;;  %v1282_v30 = vadd.f32 %v3857_v47, %v1281_v27  ;;  %2848 = vmatmul.mubr.f32.gmra.mrb[126].mxu0 %v1143_v24  ;;  %v2583_v31 = vpop.f32.mrb[143].mxu1  ;;  %v2690_v32 = vpop.f32.mrb[21].mxu0  ;;  %v140_v25 = vld [vmem:[%s4107_s5 + $0x40] sm:$0xff] }
 0x2cd   :  { %2850 = vmatprep.mubr.msk.f32.mxu0 %vm3080_vm0, %v3081_v4 }
 0x2ce   :  { %v1791_v33 = vadd.f32 %v1790_v23, %v1713_v28  ;;  %v1144_v34 = vmax.f32 %v927_v26, %v1065_v29  ;;  %v1635_v35 = vmul.f32 0.01, %v1282_v30  ;;  %v141_v26 = vld [vmem:[%s4107_s5 + $0x48] sm:$0xff] }
 0x2cf   :  { %v932_v36 = vpop.f32.mrb[144].mxu1  ;;  %v1286_v37 = vpop.f32.mrb[22].mxu0  ;;  %v3014_v29 = vpack.c.bf16 %v141_v26, %v140_v25 }
 0x2d0   :  { %v1714_v38 = vmax.f32 %v1282_v30, %v1635_v35  ;;  %v1066_v39 = vmul.f32 0.01, %v932_v36  ;;  %v1287_v40 = vadd.f32 %v3857_v47, %v1286_v37  ;;  %2851 = vmatmul.mubr.f32.gmra.mrb[128].mxu0 %v1144_v34  ;;  %v2586_v41 = vpop.f32.mrb[145].mxu1  ;;  %v2693_v42 = vpop.f32.mrb[23].mxu0 }
 0x2d1   :  { %2853 = vmatprep.mubr.msk.f32.mxu0 %vm3080_vm0, %v3081_v4  ;;  %3015 = vmatpush3.bf16.msra.mxu1 %v3014_v29 }
 0x2d2   :  { %v1792_v43 = vadd.f32 %v1791_v33, %v1714_v38  ;;  %v1145_v44 = vmax.f32 %v932_v36, %v1066_v39  ;;  %v1636_v45 = vmul.f32 0.01, %v1287_v40  ;;  %3016 = vmatprep.subr.bf16.mxu1 %v3079_v2 }
 0x2d3   :  { %v937_v46 = vpop.f32.mrb[146].mxu1  ;;  %v1291_v48 = vpop.f32.mrb[24].mxu0 }
 0x2d4   :  { %v1715_v49 = vmax.f32 %v1287_v40, %v1636_v45  ;;  %v1067_v50 = vmul.f32 0.01, %v937_v46  ;;  %v1292_v51 = vadd.f32 %v3857_v47, %v1291_v48  ;;  %2854 = vmatmul.mubr.f32.gmra.mrb[130].mxu0 %v1145_v44  ;;  %v2589_v52 = vpop.f32.mrb[147].mxu1  ;;  %v2696_v53 = vpop.f32.mrb[25].mxu0 }
 0x2d5   :  { %2856 = vmatprep.mubr.msk.f32.mxu0 %vm3080_vm0, %v3081_v4 }
 0x2d6   :  { %v1793_v54 = vadd.f32 %v1792_v43, %v1715_v49  ;;  %v1146_v55 = vmax.f32 %v937_v46, %v1067_v50  ;;  %v1637_v56 = vmul.f32 0.01, %v1292_v51 }
 0x2d7   :  { %v942_v57 = vpop.f32.mrb[148].mxu1  ;;  %v1296_v58 = vpop.f32.mrb[26].mxu0 }
 0x2d8   :  { %v1716_v59 = vmax.f32 %v1292_v51, %v1637_v56  ;;  %v1068_v60 = vmul.f32 0.01, %v942_v57  ;;  %v1297_v61 = vadd.f32 %v3857_v47, %v1296_v58  ;;  %2857 = vmatmul.mubr.f32.gmra.mrb[132].mxu0 %v1146_v55  ;;  %v2592_v62 = vpop.f32.mrb[149].mxu1  ;;  %v2699_v63 = vpop.f32.mrb[27].mxu0 }
 0x2d9   :  { %2859 = vmatprep.mubr.msk.f32.mxu0 %vm3080_vm0, %v3081_v4 }
 0x2da   :  { %v1794_v0 = vadd.f32 %v1793_v54, %v1716_v59  ;;  %v1147_v1 = vmax.f32 %v942_v57, %v1068_v60  ;;  %v1638_v3 = vmul.f32 0.01, %v1297_v61 }
 0x2db   :  { %v947_v5 = vpop.f32.mrb[150].mxu1  ;;  %v1301_v6 = vpop.f32.mrb[28].mxu0 }
 0x2dc   :  { %v1717_v7 = vmax.f32 %v1297_v61, %v1638_v3  ;;  %v1069_v8 = vmul.f32 0.01, %v947_v5  ;;  %v1302_v9 = vadd.f32 %v3857_v47, %v1301_v6  ;;  %2860 = vmatmul.mubr.f32.gmra.mrb[134].mxu0 %v1147_v1  ;;  %v2595_v10 = vpop.f32.mrb[151].mxu1  ;;  %v2702_v11 = vpop.f32.mrb[29].mxu0 }
 0x2dd   :  { %2862 = vmatprep.mubr.msk.f32.mxu0 %vm3080_vm0, %v3081_v4 }
 0x2de   :  { %v1795_v12 = vadd.f32 %v1794_v0, %v1717_v7  ;;  %v1148_v13 = vmax.f32 %v947_v5, %v1069_v8  ;;  %v1639_v14 = vmul.f32 0.01, %v1302_v9 }
 0x2df   :  { %v952_v15 = vpop.f32.mrb[152].mxu1  ;;  %v1306_v16 = vpop.f32.mrb[30].mxu0 }
 0x2e0   :  { %v1718_v17 = vmax.f32 %v1302_v9, %v1639_v14  ;;  %v1070_v18 = vmul.f32 0.01, %v952_v15  ;;  %v1307_v19 = vadd.f32 %v3857_v47, %v1306_v16  ;;  %2863 = vmatmul.mubr.f32.gmra.mrb[136].mxu0 %v1148_v13  ;;  %v2598_v20 = vpop.f32.mrb[153].mxu1  ;;  %v2705_v21 = vpop.f32.mrb[31].mxu0 }
 0x2e1   :  { %2865 = vmatprep.mubr.msk.f32.mxu0 %vm3080_vm0, %v3081_v4 }
 0x2e2   :  { %v1796_v22 = vadd.f32 %v1795_v12, %v1718_v17  ;;  %v1149_v23 = vmax.f32 %v952_v15, %v1070_v18  ;;  %v1640_v24 = vmul.f32 0.01, %v1307_v19 }
 0x2e3   :  { %v957_v27 = vpop.f32.mrb[154].mxu1  ;;  %v1311_v28 = vpop.f32.mrb[32].mxu0 }
 0x2e4   :  { %v1719_v30 = vmax.f32 %v1307_v19, %v1640_v24  ;;  %v1071_v31 = vmul.f32 0.01, %v957_v27  ;;  %v1312_v32 = vadd.f32 %v3857_v47, %v1311_v28  ;;  %2866 = vmatmul.mubr.f32.gmra.mrb[138].mxu0 %v1149_v23  ;;  %v2601_v33 = vpop.f32.mrb[155].mxu1  ;;  %v2708_v34 = vpop.f32.mrb[33].mxu0 }
 0x2e5   :  { %2868 = vmatprep.mubr.msk.f32.mxu0 %vm3080_vm0, %v3081_v4 }
 0x2e6   :  { %v1797_v35 = vadd.f32 %v1796_v22, %v1719_v30  ;;  %v1150_v36 = vmax.f32 %v957_v27, %v1071_v31  ;;  %v1641_v37 = vmul.f32 0.01, %v1312_v32 }
 0x2e7   :  { %v962_v38 = vpop.f32.mrb[156].mxu1  ;;  %v1316_v39 = vpop.f32.mrb[34].mxu0 }
 0x2e8   :  { %v1720_v40 = vmax.f32 %v1312_v32, %v1641_v37  ;;  %v1072_v41 = vmul.f32 0.01, %v962_v38  ;;  %v1317_v42 = vadd.f32 %v3857_v47, %v1316_v39  ;;  %2869 = vmatmul.mubr.f32.gmra.mrb[140].mxu0 %v1150_v36  ;;  %v2604_v43 = vpop.f32.mrb[157].mxu1  ;;  %v2711_v44 = vpop.f32.mrb[35].mxu0 }
 0x2e9   :  { %2871 = vmatprep.mubr.msk.f32.mxu0 %vm3080_vm0, %v3081_v4 }
 0x2ea   :  { %v1798_v45 = vadd.f32 %v1797_v35, %v1720_v40  ;;  %v1151_v46 = vmax.f32 %v962_v38, %v1072_v41  ;;  %v1642_v48 = vmul.f32 0.01, %v1317_v42 }
 0x2eb   :  { %v967_v49 = vpop.f32.mrb[158].mxu1  ;;  %v1321_v50 = vpop.f32.mrb[36].mxu0 }
 0x2ec   :  { %v1721_v51 = vmax.f32 %v1317_v42, %v1642_v48  ;;  %v1073_v52 = vmul.f32 0.01, %v967_v49  ;;  %v1322_v53 = vadd.f32 %v3857_v47, %v1321_v50  ;;  %2872 = vmatmul.mubr.f32.gmra.mrb[142].mxu0 %v1151_v46  ;;  %v2607_v54 = vpop.f32.mrb[159].mxu1  ;;  %v2714_v55 = vpop.f32.mrb[37].mxu0 }
 0x2ed   :  { %2874 = vmatprep.mubr.msk.f32.mxu0 %vm3080_vm0, %v3081_v4 }
 0x2ee   :  { %v1799_v56 = vadd.f32 %v1798_v45, %v1721_v51  ;;  %v1152_v57 = vmax.f32 %v967_v49, %v1073_v52  ;;  %v1643_v58 = vmul.f32 0.01, %v1322_v53 }
 0x2ef   :  { %v972_v59 = vpop.f32.mrb[160].mxu1  ;;  %v1326_v60 = vpop.f32.mrb[38].mxu0 }
 0x2f0   :  { %v1722_v61 = vmax.f32 %v1322_v53, %v1643_v58  ;;  %v1074_v62 = vmul.f32 0.01, %v972_v59  ;;  %v1327_v63 = vadd.f32 %v3857_v47, %v1326_v60  ;;  %2875 = vmatmul.mubr.f32.gmra.mrb[144].mxu0 %v1152_v57  ;;  %v2610_v0 = vpop.f32.mrb[161].mxu1  ;;  %v2717_v1 = vpop.f32.mrb[39].mxu0 }
 0x2f1   :  { %2877 = vmatprep.mubr.msk.f32.mxu0 %vm3080_vm0, %v3081_v4  ;;  %v142_v0 = vld [vmem:[%s4107_s5 + $0x50] sm:$0xff]  ;;  %v143_v1 = vld [vmem:[%s4107_s5 + $0x58] sm:$0xff] }
 0x2f2   :  { %v1800_v3 = vadd.f32 %v1799_v56, %v1722_v61  ;;  %v1153_v5 = vmax.f32 %v972_v59, %v1074_v62  ;;  %v1644_v6 = vmul.f32 0.01, %v1327_v63 }
 0x2f3   :  { %v977_v7 = vpop.f32.mrb[162].mxu1  ;;  %v1331_v8 = vpop.f32.mrb[40].mxu0 }
 0x2f4   :  { %v1723_v9 = vmax.f32 %v1327_v63, %v1644_v6  ;;  %v1075_v10 = vmul.f32 0.01, %v977_v7  ;;  %v1332_v11 = vadd.f32 %v3857_v47, %v1331_v8  ;;  %2878 = vmatmul.mubr.f32.gmra.mrb[146].mxu0 %v1153_v5  ;;  %v2613_v12 = vpop.f32.mrb[163].mxu1  ;;  %v2720_v13 = vpop.f32.mrb[41].mxu0  ;;  %v3017_v5 = vpack.c.bf16 %v143_v1, %v142_v0 }
 0x2f5   :  { %2880 = vmatprep.mubr.msk.f32.mxu0 %vm3080_vm0, %v3081_v4 }
 0x2f6   :  { %v1801_v14 = vadd.f32 %v1800_v3, %v1723_v9  ;;  %v1154_v15 = vmax.f32 %v977_v7, %v1075_v10  ;;  %v1645_v16 = vmul.f32 0.01, %v1332_v11  ;;  %3018 = vmatpush3.bf16.msra.mxu1 %v3017_v5 }
 0x2f7   :  { %v982_v17 = vpop.f32.mrb[164].mxu1  ;;  %v1336_v18 = vpop.f32.mrb[42].mxu0  ;;  %3019 = vmatprep.subr.bf16.mxu1 %v3079_v2 }
 0x2f8   :  { %v1724_v19 = vmax.f32 %v1332_v11, %v1645_v16  ;;  %v1076_v20 = vmul.f32 0.01, %v982_v17  ;;  %v1337_v21 = vadd.f32 %v3857_v47, %v1336_v18  ;;  %2881 = vmatmul.mubr.f32.gmra.mrb[148].mxu0 %v1154_v15  ;;  %v2616_v22 = vpop.f32.mrb[165].mxu1  ;;  %v2723_v23 = vpop.f32.mrb[43].mxu0 }
 0x2f9   :  { %2883 = vmatprep.mubr.msk.f32.mxu0 %vm3080_vm0, %v3081_v4 }
 0x2fa   :  { %v1802_v24 = vadd.f32 %v1801_v14, %v1724_v19  ;;  %v1155_v25 = vmax.f32 %v982_v17, %v1076_v20  ;;  %v1646_v26 = vmul.f32 0.01, %v1337_v21 }
 0x2fb   :  { %v987_v27 = vpop.f32.mrb[166].mxu1  ;;  %v1341_v28 = vpop.f32.mrb[44].mxu0 }
 0x2fc   :  { %v1725_v29 = vmax.f32 %v1337_v21, %v1646_v26  ;;  %v1077_v30 = vmul.f32 0.01, %v987_v27  ;;  %v1342_v31 = vadd.f32 %v3857_v47, %v1341_v28  ;;  %2884 = vmatmul.mubr.f32.gmra.mrb[150].mxu0 %v1155_v25  ;;  %v2619_v32 = vpop.f32.mrb[167].mxu1  ;;  %v2726_v33 = vpop.f32.mrb[45].mxu0 }
 0x2fd   :  { %2886 = vmatprep.mubr.msk.f32.mxu0 %vm3080_vm0, %v3081_v4 }
 0x2fe   :  { %v1803_v34 = vadd.f32 %v1802_v24, %v1725_v29  ;;  %v1156_v35 = vmax.f32 %v987_v27, %v1077_v30  ;;  %v1647_v36 = vmul.f32 0.01, %v1342_v31 }
 0x2ff   :  { %v992_v37 = vpop.f32.mrb[168].mxu1  ;;  %v1346_v38 = vpop.f32.mrb[46].mxu0 }
 0x300   :  { %v1726_v39 = vmax.f32 %v1342_v31, %v1647_v36  ;;  %v1078_v40 = vmul.f32 0.01, %v992_v37  ;;  %v1347_v41 = vadd.f32 %v3857_v47, %v1346_v38  ;;  %2887 = vmatmul.mubr.f32.gmra.mrb[152].mxu0 %v1156_v35  ;;  %v2622_v42 = vpop.f32.mrb[169].mxu1  ;;  %v2729_v43 = vpop.f32.mrb[47].mxu0  ;;  %v150_v35 = vld [vmem:[%s4109_s7 + $0x8] sm:$0xff] }
 0x301   :  { %2889 = vmatprep.mubr.msk.f32.mxu0 %vm3080_vm0, %v3081_v4 }
 0x302   :  { %v1804_v44 = vadd.f32 %v1803_v34, %v1726_v39  ;;  %v1157_v45 = vmax.f32 %v992_v37, %v1078_v40  ;;  %v1648_v46 = vmul.f32 0.01, %v1347_v41  ;;  %v149_v34 = vld [vmem:[%s4109_s7] sm:$0xff] }
 0x303   :  { %v997_v48 = vpop.f32.mrb[170].mxu1  ;;  %v1351_v49 = vpop.f32.mrb[48].mxu0  ;;  %v3026_v37 = vpack.c.bf16 %v150_v35, %v149_v34 }
 0x304   :  { %v1727_v50 = vmax.f32 %v1347_v41, %v1648_v46  ;;  %v1079_v51 = vmul.f32 0.01, %v997_v48  ;;  %v1352_v52 = vadd.f32 %v3857_v47, %v1351_v49  ;;  %2890 = vmatmul.mubr.f32.gmra.mrb[154].mxu0 %v1157_v45  ;;  %v2732_v53 = vpop.f32.mrb[49].mxu0  ;;  %v2625_v54 = vpop.f32.mrb[171].mxu1 }
 0x305   :  { %2892 = vmatprep.mubr.msk.f32.mxu0 %vm3080_vm0, %v3081_v4  ;;  %3027 = vmatpush3.bf16.msra.mxu0 %v3026_v37 }
 0x306   :  { %v1805_v55 = vadd.f32 %v1804_v44, %v1727_v50  ;;  %v1158_v56 = vmax.f32 %v997_v48, %v1079_v51  ;;  %v1649_v57 = vmul.f32 0.01, %v1352_v52  ;;  %3028 = vmatprep.subr.bf16.mxu0 %v3079_v2 }
 0x307   :  { %v1356_v58 = vpop.f32.mrb[50].mxu0 }
 0x308   :  { %v1728_v59 = vmax.f32 %v1352_v52, %v1649_v57  ;;  %v1357_v60 = vadd.f32 %v3857_v47, %v1356_v58  ;;  %2893 = vmatmul.mubr.f32.gmra.mrb[156].mxu0 %v1158_v56  ;;  %v2735_v61 = vpop.f32.mrb[51].mxu0 }
 0x309   :  { %2962 = vmatprep.mubr.msk.f32.mxu0 %vm3080_vm0, %v3081_v4 }
 0x30a   :  { %v1806_v62 = vadd.f32 %v1805_v55, %v1728_v59  ;;  %v1650_v63 = vmul.f32 0.01, %v1357_v60 }
 0x30b   :  { %v1361_v3 = vpop.f32.mrb[52].mxu0 }
 0x30c   :  { %v1729_v6 = vmax.f32 %v1357_v60, %v1650_v63  ;;  %v1362_v7 = vadd.f32 %v3857_v47, %v1361_v3  ;;  %v2738_v8 = vpop.f32.mrb[53].mxu0 }
 0x30e   :  { %v1807_v9 = vadd.f32 %v1806_v62, %v1729_v6  ;;  %v1651_v10 = vmul.f32 0.01, %v1362_v7  ;;  %v144_v6 = vld [vmem:[%s4107_s5 + $0x60] sm:$0xff] }
 0x30f   :  { %v1366_v4 = vpop.f32.mrb[54].mxu0 }
 0x310   :  { %v1730_v11 = vmax.f32 %v1362_v7, %v1651_v10  ;;  %v1367_v12 = vadd.f32 %v3857_v47, %v1366_v4  ;;  %v2741_v13 = vpop.f32.mrb[55].mxu0  ;;  %v145_v7 = vld [vmem:[%s4107_s5 + $0x68] sm:$0xff] }
 0x312   :  { %v1808_v14 = vadd.f32 %v1807_v9, %v1730_v11  ;;  %v1652_v15 = vmul.f32 0.01, %v1367_v12  ;;  %v3020_v9 = vpack.c.bf16 %v145_v7, %v144_v6 }
 0x313   :  { %v1371_v16 = vpop.f32.mrb[56].mxu0 }
 0x314   :  { %v1731_v17 = vmax.f32 %v1367_v12, %v1652_v15  ;;  %v1372_v18 = vadd.f32 %v3857_v47, %v1371_v16  ;;  %v2744_v19 = vpop.f32.mrb[57].mxu0  ;;  %3021 = vmatpush3.bf16.msra.mxu1 %v3020_v9 }
 0x315   :  { %3022 = vmatprep.subr.bf16.mxu1 %v3079_v2 }
 0x316   :  { %v1809_v20 = vadd.f32 %v1808_v14, %v1731_v17  ;;  %v1653_v21 = vmul.f32 0.01, %v1372_v18 }
 0x317   :  { %v1376_v22 = vpop.f32.mrb[58].mxu0 }
 0x318   :  { %v1732_v23 = vmax.f32 %v1372_v18, %v1653_v21  ;;  %v1377_v24 = vadd.f32 %v3857_v47, %v1376_v22  ;;  %v2747_v25 = vpop.f32.mrb[59].mxu0 }
 0x31a   :  { %v1810_v26 = vadd.f32 %v1809_v20, %v1732_v23  ;;  %v1654_v27 = vmul.f32 0.01, %v1377_v24 }
 0x31b   :  { %v1381_v28 = vpop.f32.mrb[60].mxu0 }
 0x31c   :  { %v1733_v29 = vmax.f32 %v1377_v24, %v1654_v27  ;;  %v1382_v30 = vadd.f32 %v3857_v47, %v1381_v28  ;;  %v2750_v31 = vpop.f32.mrb[61].mxu0 }
 0x31e   :  { %v1811_v32 = vadd.f32 %v1810_v26, %v1733_v29  ;;  %v1655_v33 = vmul.f32 0.01, %v1382_v30 }
 0x31f   :  { %v1386_v36 = vpop.f32.mrb[62].mxu0 }
 0x320   :  { %v1734_v38 = vmax.f32 %v1382_v30, %v1655_v33  ;;  %v1387_v39 = vadd.f32 %v3857_v47, %v1386_v36  ;;  %v2753_v40 = vpop.f32.mrb[63].mxu0 }
 0x322   :  { %v1812_v41 = vadd.f32 %v1811_v32, %v1734_v38  ;;  %v1656_v42 = vmul.f32 0.01, %v1387_v39  ;;  %v151_v38 = vld [vmem:[%s4109_s7 + $0x10] sm:$0xff] }
 0x323   :  { %v1391_v43 = vpop.f32.mrb[64].mxu0 }
 0x324   :  { %v1735_v44 = vmax.f32 %v1387_v39, %v1656_v42  ;;  %v1392_v45 = vadd.f32 %v3857_v47, %v1391_v43  ;;  %v2756_v46 = vpop.f32.mrb[65].mxu0  ;;  %v152_v39 = vld [vmem:[%s4109_s7 + $0x18] sm:$0xff] }
 0x326   :  { %v1813_v48 = vadd.f32 %v1812_v41, %v1735_v44  ;;  %v1657_v49 = vmul.f32 0.01, %v1392_v45  ;;  %v3029_v41 = vpack.c.bf16 %v152_v39, %v151_v38 }
 0x327   :  { %v1396_v50 = vpop.f32.mrb[66].mxu0 }
 0x328   :  { %v1736_v51 = vmax.f32 %v1392_v45, %v1657_v49  ;;  %v1397_v52 = vadd.f32 %v3857_v47, %v1396_v50  ;;  %v2759_v53 = vpop.f32.mrb[67].mxu0  ;;  %3030 = vmatpush3.bf16.msra.mxu0 %v3029_v41 }
 0x329   :  { %3031 = vmatprep.subr.bf16.mxu0 %v3079_v2 }
 0x32a   :  { %v1814_v54 = vadd.f32 %v1813_v48, %v1736_v51  ;;  %v1658_v55 = vmul.f32 0.01, %v1397_v52 }
 0x32b   :  { %v1401_v56 = vpop.f32.mrb[68].mxu0 }
 0x32c   :  { %v1737_v57 = vmax.f32 %v1397_v52, %v1658_v55  ;;  %v1402_v58 = vadd.f32 %v3857_v47, %v1401_v56  ;;  %v2762_v59 = vpop.f32.mrb[69].mxu0 }
 0x32e   :  { %v1815_v60 = vadd.f32 %v1814_v54, %v1737_v57  ;;  %v1659_v61 = vmul.f32 0.01, %v1402_v58 }
 0x32f   :  { %v1406_v62 = vpop.f32.mrb[70].mxu0 }
 0x330   :  { %v1738_v63 = vmax.f32 %v1402_v58, %v1659_v61  ;;  %v1407_v0 = vadd.f32 %v3857_v47, %v1406_v62  ;;  %v2765_v1 = vpop.f32.mrb[71].mxu0 }
 0x332   :  { %v1816_v3 = vadd.f32 %v1815_v60, %v1738_v63  ;;  %v1660_v5 = vmul.f32 0.01, %v1407_v0 }
 0x333   :  { %v1411_v8 = vpop.f32.mrb[72].mxu0 }
 0x334   :  { %v1739_v10 = vmax.f32 %v1407_v0, %v1660_v5  ;;  %v1412_v4 = vadd.f32 %v3857_v47, %v1411_v8  ;;  %v2768_v11 = vpop.f32.mrb[73].mxu0 }
 0x336   :  { %v1817_v12 = vadd.f32 %v1816_v3, %v1739_v10  ;;  %v1661_v13 = vmul.f32 0.01, %v1412_v4  ;;  %v146_v10 = vld [vmem:[%s4107_s5 + $0x70] sm:$0xff] }
 0x337   :  { %v1416_v14 = vpop.f32.mrb[74].mxu0 }
 0x338   :  { %v1740_v15 = vmax.f32 %v1412_v4, %v1661_v13  ;;  %v1417_v16 = vadd.f32 %v3857_v47, %v1416_v14  ;;  %v2771_v17 = vpop.f32.mrb[75].mxu0  ;;  %v147_v4 = vld [vmem:[%s4107_s5 + $0x78] sm:$0xff] }
 0x33a   :  { %v1818_v18 = vadd.f32 %v1817_v12, %v1740_v15  ;;  %v1662_v19 = vmul.f32 0.01, %v1417_v16  ;;  %v3023_v12 = vpack.c.bf16 %v147_v4, %v146_v10 }
 0x33b   :  { %v1421_v20 = vpop.f32.mrb[76].mxu0 }
 0x33c   :  { %v1741_v21 = vmax.f32 %v1417_v16, %v1662_v19  ;;  %v1422_v22 = vadd.f32 %v3857_v47, %v1421_v20  ;;  %v2774_v23 = vpop.f32.mrb[77].mxu0  ;;  %3024 = vmatpush3.bf16.msra.mxu1 %v3023_v12  ;;  %v162_v12 = vld [vmem:[%s4109_s7 + $0x68] sm:$0xff] }
 0x33e   :  { %v1819_v24 = vadd.f32 %v1818_v18, %v1741_v21  ;;  %v1663_v25 = vmul.f32 0.01, %v1422_v22 }
 0x33f   :  { %v1426_v26 = vpop.f32.mrb[78].mxu0 }
 0x340   :  { %v1742_v27 = vmax.f32 %v1422_v22, %v1663_v25  ;;  %v1427_v28 = vadd.f32 %v3857_v47, %v1426_v26  ;;  %v2777_v29 = vpop.f32.mrb[79].mxu0 }
 0x342   :  { %v1820_v30 = vadd.f32 %v1819_v24, %v1742_v27  ;;  %v1664_v31 = vmul.f32 0.01, %v1427_v28 }
 0x343   :  { %v1431_v32 = vpop.f32.mrb[80].mxu0 }
 0x344   :  { %v1743_v33 = vmax.f32 %v1427_v28, %v1664_v31  ;;  %v1432_v34 = vadd.f32 %v3857_v47, %v1431_v32  ;;  %v2780_v35 = vpop.f32.mrb[81].mxu0 }
 0x346   :  { %v1821_v36 = vadd.f32 %v1820_v30, %v1743_v33  ;;  %v1665_v37 = vmul.f32 0.01, %v1432_v34 }
 0x347   :  { %v1436_v40 = vpop.f32.mrb[82].mxu0 }
 0x348   :  { %v1744_v42 = vmax.f32 %v1432_v34, %v1665_v37  ;;  %v1437_v43 = vadd.f32 %v3857_v47, %v1436_v40  ;;  %v2783_v44 = vpop.f32.mrb[83].mxu0 }
 0x349   :  { %v154_v44 = vld [vmem:[%s4109_s7 + $0x28] sm:$0xff] }
 0x34a   :  { %v1822_v45 = vadd.f32 %v1821_v36, %v1744_v42  ;;  %v1666_v46 = vmul.f32 0.01, %v1437_v43 }
 0x34b   :  { %v1441_v48 = vpop.f32.mrb[84].mxu0 }
 0x34c   :  { %v1745_v49 = vmax.f32 %v1437_v43, %v1666_v46  ;;  %v1442_v50 = vadd.f32 %v3857_v47, %v1441_v48  ;;  %v2786_v51 = vpop.f32.mrb[85].mxu0  ;;  %v153_v43 = vld [vmem:[%s4109_s7 + $0x20] sm:$0xff] }
 0x34d   :  { %v156_v51 = vld [vmem:[%s4109_s7 + $0x38] sm:$0xff] }
 0x34e   :  { %v1823_v52 = vadd.f32 %v1822_v45, %v1745_v49  ;;  %v1667_v53 = vmul.f32 0.01, %v1442_v50  ;;  %v3032_v49 = vpack.c.bf16 %v154_v44, %v153_v43 }
 0x34f   :  { %v1446_v54 = vpop.f32.mrb[86].mxu0 }
 0x350   :  { %v1746_v55 = vmax.f32 %v1442_v50, %v1667_v53  ;;  %v1447_v56 = vadd.f32 %v3857_v47, %v1446_v54  ;;  %v2789_v57 = vpop.f32.mrb[87].mxu0  ;;  %v155_v50 = vld [vmem:[%s4109_s7 + $0x30] sm:$0xff]  ;;  %3033 = vmatpush3.bf16.msra.mxu0 %v3032_v49 }
 0x351   :  { %v3035_v54 = vpack.c.bf16 %v156_v51, %v155_v50  ;;  %3034 = vmatprep.subr.bf16.mxu0 %v3079_v2  ;;  %v158_v57 = vld [vmem:[%s4109_s7 + $0x48] sm:$0xff] }
 0x352   :  { %v1824_v58 = vadd.f32 %v1823_v52, %v1746_v55  ;;  %v1668_v59 = vmul.f32 0.01, %v1447_v56 }
 0x353   :  { %v1451_v60 = vpop.f32.mrb[88].mxu0 }
 0x354   :  { %v1747_v61 = vmax.f32 %v1447_v56, %v1668_v59  ;;  %v1452_v62 = vadd.f32 %v3857_v47, %v1451_v60  ;;  %v2792_v63 = vpop.f32.mrb[89].mxu0  ;;  %v157_v56 = vld [vmem:[%s4109_s7 + $0x40] sm:$0xff]  ;;  %3036 = vmatpush3.bf16.msra.mxu0 %v3035_v54 }
 0x355   :  { %v3038_v63 = vpack.c.bf16 %v158_v57, %v157_v56  ;;  %3037 = vmatprep.subr.bf16.mxu0 %v3079_v2 }
 0x356   :  { %v1825_v0 = vadd.f32 %v1824_v58, %v1747_v61  ;;  %v1669_v1 = vmul.f32 0.01, %v1452_v62 }
 0x357   :  { %v1456_v3 = vpop.f32.mrb[90].mxu0 }
 0x358   :  { %v1748_v5 = vmax.f32 %v1452_v62, %v1669_v1  ;;  %v1457_v6 = vadd.f32 %v3857_v47, %v1456_v3  ;;  %v2795_v7 = vpop.f32.mrb[91].mxu0  ;;  %v159_v1 = vld [vmem:[%s4109_s7 + $0x50] sm:$0xff]  ;;  %v160_v3 = vld [vmem:[%s4109_s7 + $0x58] sm:$0xff]  ;;  %3039 = vmatpush3.bf16.msra.mxu0 %v3038_v63 }
 0x359   :  { %v3041_v10 = vpack.c.bf16 %v160_v3, %v159_v1  ;;  %3040 = vmatprep.subr.bf16.mxu0 %v3079_v2 }
 0x35a   :  { %v1826_v8 = vadd.f32 %v1825_v0, %v1748_v5  ;;  %v1670_v9 = vmul.f32 0.01, %v1457_v6 }
 0x35b   :  { %v1461_v11 = vpop.f32.mrb[92].mxu0 }
 0x35c   :  { %v1749_v13 = vmax.f32 %v1457_v6, %v1670_v9  ;;  %v1462_v14 = vadd.f32 %v3857_v47, %v1461_v11  ;;  %v2798_v15 = vpop.f32.mrb[93].mxu0  ;;  %v161_v11 = vld [vmem:[%s4109_s7 + $0x60] sm:$0xff]  ;;  %3042 = vmatpush3.bf16.msra.mxu0 %v3041_v10 }
 0x35d   :  { %3043 = vmatprep.subr.bf16.mxu0 %v3079_v2 }
 0x35e   :  { %v1827_v16 = vadd.f32 %v1826_v8, %v1749_v13  ;;  %v1671_v17 = vmul.f32 0.01, %v1462_v14 }
 0x35f   :  { %v1466_v18 = vpop.f32.mrb[94].mxu0 }
 0x360   :  { %v1750_v19 = vmax.f32 %v1462_v14, %v1671_v17  ;;  %v1467_v20 = vadd.f32 %v3857_v47, %v1466_v18  ;;  %v2801_v21 = vpop.f32.mrb[95].mxu0  ;;  %v3044_v18 = vpack.c.bf16 %v162_v12, %v161_v11 }
 0x361   :  { %v164_v21 = vld [vmem:[%s4109_s7 + $0x78] sm:$0xff] }
 0x362   :  { %v1828_v22 = vadd.f32 %v1827_v16, %v1750_v19  ;;  %v1672_v23 = vmul.f32 0.01, %v1467_v20  ;;  %3045 = vmatpush3.bf16.msra.mxu0 %v3044_v18 }
 0x363   :  { %v1471_v24 = vpop.f32.mrb[96].mxu0  ;;  %3046 = vmatprep.subr.bf16.mxu0 %v3079_v2 }
 0x364   :  { %v1751_v25 = vmax.f32 %v1467_v20, %v1672_v23  ;;  %v1472_v26 = vadd.f32 %v3857_v47, %v1471_v24  ;;  %v2804_v27 = vpop.f32.mrb[97].mxu0  ;;  %v163_v20 = vld [vmem:[%s4109_s7 + $0x70] sm:$0xff] }
 0x365   :  { %v3047_v27 = vpack.c.bf16 %v164_v21, %v163_v20 }
 0x366   :  { %v1829_v28 = vadd.f32 %v1828_v22, %v1751_v25  ;;  %v1673_v29 = vmul.f32 0.01, %v1472_v26 }
 0x367   :  { %v1476_v30 = vpop.f32.mrb[98].mxu0  ;;  %3048 = vmatpush3.bf16.msra.mxu0 %v3047_v27 }
 0x368   :  { %v1752_v31 = vmax.f32 %v1472_v26, %v1673_v29  ;;  %v1477_v32 = vadd.f32 %v3857_v47, %v1476_v30  ;;  %v2807_v33 = vpop.f32.mrb[99].mxu0 }
 0x36a   :  { %v1830_v34 = vadd.f32 %v1829_v28, %v1752_v31  ;;  %v1674_v35 = vmul.f32 0.01, %v1477_v32 }
 0x36b   :  { %v1481_v36 = vpop.f32.mrb[100].mxu0 }
 0x36c   :  { %v1753_v37 = vmax.f32 %v1477_v32, %v1674_v35  ;;  %v1482_v38 = vadd.f32 %v3857_v47, %v1481_v36  ;;  %v2810_v39 = vpop.f32.mrb[101].mxu0 }
 0x36e   :  { %v1831_v40 = vadd.f32 %v1830_v34, %v1753_v37  ;;  %v1675_v41 = vmul.f32 0.01, %v1482_v38 }
 0x36f   :  { %v1486_v42 = vpop.f32.mrb[102].mxu0 }
 0x370   :  { %v1754_v45 = vmax.f32 %v1482_v38, %v1675_v41  ;;  %v1487_v46 = vadd.f32 %v3857_v47, %v1486_v42  ;;  %v2813_v48 = vpop.f32.mrb[103].mxu0 }
 0x372   :  { %v1832_v52 = vadd.f32 %v1831_v40, %v1754_v45  ;;  %v1676_v53 = vmul.f32 0.01, %v1487_v46 }
 0x373   :  { %v1491_v55 = vpop.f32.mrb[104].mxu0 }
 0x374   :  { %v1755_v58 = vmax.f32 %v1487_v46, %v1676_v53  ;;  %v1492_v59 = vadd.f32 %v3857_v47, %v1491_v55  ;;  %v2816_v60 = vpop.f32.mrb[105].mxu0  ;;  %v4041_v47 = vld [vmem:[%s4106_s4] ss:$0 sm:$0xff] }
 0x376   :  { %v1833_v61 = vadd.f32 %v1832_v52, %v1755_v58  ;;  %v1677_v62 = vmul.f32 0.01, %v1492_v59 }
 0x377   :  { %v1496_v0 = vpop.f32.mrb[106].mxu0 }
 0x378   :  { %v1756_v5 = vmax.f32 %v1492_v59, %v1677_v62  ;;  %v1497_v6 = vadd.f32 %v4041_v47, %v1496_v0  ;;  %v2819_v7 = vpop.f32.mrb[107].mxu0 }
 0x37a   :  { %v1834_v8 = vadd.f32 %v1833_v61, %v1756_v5  ;;  %v1678_v9 = vmul.f32 0.01, %v1497_v6 }
 0x37b   :  { %v1501_v4 = vpop.f32.mrb[108].mxu0 }
 0x37c   :  { %v1757_v13 = vmax.f32 %v1497_v6, %v1678_v9  ;;  %v1502_v14 = vadd.f32 %v4041_v47, %v1501_v4  ;;  %v2822_v15 = vpop.f32.mrb[109].mxu0 }
 0x37e   :  { %v1835_v16 = vadd.f32 %v1834_v8, %v1757_v13  ;;  %v1679_v17 = vmul.f32 0.01, %v1502_v14 }
 0x37f   :  { %v1506_v19 = vpop.f32.mrb[110].mxu0 }
 0x380   :  { %v1758_v22 = vmax.f32 %v1502_v14, %v1679_v17  ;;  %v1507_v23 = vadd.f32 %v4041_v47, %v1506_v19  ;;  %v2825_v24 = vpop.f32.mrb[111].mxu0 }
 0x382   :  { %v1836_v25 = vadd.f32 %v1835_v16, %v1758_v22  ;;  %v1680_v26 = vmul.f32 0.01, %v1507_v23 }
 0x383   :  { %v1511_v28 = vpop.f32.mrb[112].mxu0 }
 0x384   :  { %v1759_v29 = vmax.f32 %v1507_v23, %v1680_v26  ;;  %v1512_v30 = vadd.f32 %v4041_v47, %v1511_v28  ;;  %v2828_v31 = vpop.f32.mrb[113].mxu0 }
 0x386   :  { %v1837_v32 = vadd.f32 %v1836_v25, %v1759_v29  ;;  %v1681_v33 = vmul.f32 0.01, %v1512_v30 }
 0x387   :  { %v1516_v34 = vpop.f32.mrb[114].mxu0 }
 0x388   :  { %v1760_v35 = vmax.f32 %v1512_v30, %v1681_v33  ;;  %v1517_v36 = vadd.f32 %v4041_v47, %v1516_v34  ;;  %v2831_v37 = vpop.f32.mrb[115].mxu0 }
 0x38a   :  { %v1838_v38 = vadd.f32 %v1837_v32, %v1760_v35  ;;  %v1682_v39 = vmul.f32 0.01, %v1517_v36 }
 0x38b   :  { %v1521_v40 = vpop.f32.mrb[116].mxu0 }
 0x38c   :  { %v1761_v41 = vmax.f32 %v1517_v36, %v1682_v39  ;;  %v1522_v42 = vadd.f32 %v4041_v47, %v1521_v40  ;;  %v2834_v43 = vpop.f32.mrb[117].mxu0 }
 0x38e   :  { %v1839_v2 = vadd.f32 %v1838_v38, %v1761_v41  ;;  %v1683_v44 = vmul.f32 0.01, %v1522_v42 }
 0x38f   :  { %v1526_v45 = vpop.f32.mrb[118].mxu0 }
 0x390   :  { %v1762_v46 = vmax.f32 %v1522_v42, %v1683_v44  ;;  %v1527_v48 = vadd.f32 %v4041_v47, %v1526_v45  ;;  %v2837_v49 = vpop.f32.mrb[119].mxu0 }
 0x392   :  { %v1840_v50 = vadd.f32 %v1839_v2, %v1762_v46  ;;  %v1684_v51 = vmul.f32 0.01, %v1527_v48 }
 0x393   :  { %v1531_v52 = vpop.f32.mrb[120].mxu0 }
 0x394   :  { %v1763_v53 = vmax.f32 %v1527_v48, %v1684_v51  ;;  %v1532_v54 = vadd.f32 %v4041_v47, %v1531_v52  ;;  %v2840_v55 = vpop.f32.mrb[121].mxu0 }
 0x396   :  { %v1841_v56 = vadd.f32 %v1840_v50, %v1763_v53  ;;  %v1685_v57 = vmul.f32 0.01, %v1532_v54 }
 0x397   :  { %v1536_v58 = vpop.f32.mrb[122].mxu0 }
 0x398   :  { %v1764_v59 = vmax.f32 %v1532_v54, %v1685_v57  ;;  %v1537_v60 = vadd.f32 %v4041_v47, %v1536_v58  ;;  %v2843_v61 = vpop.f32.mrb[123].mxu0 }
 0x39a   :  { %v1842_v62 = vadd.f32 %v1841_v56, %v1764_v59  ;;  %v1686_v63 = vmul.f32 0.01, %v1537_v60 }
 0x39b   :  { %v1541_v0 = vpop.f32.mrb[124].mxu0 }
 0x39c   :  { %v1765_v1 = vmax.f32 %v1537_v60, %v1686_v63  ;;  %v1542_v3 = vadd.f32 %v4041_v47, %v1541_v0  ;;  %v2846_v5 = vpop.f32.mrb[125].mxu0 }
 0x39e   :  { %v1843_v6 = vadd.f32 %v1842_v62, %v1765_v1  ;;  %v1687_v7 = vmul.f32 0.01, %v1542_v3 }
 0x39f   :  { %v1546_v8 = vpop.f32.mrb[126].mxu0 }
 0x3a0   :  { %v1766_v9 = vmax.f32 %v1542_v3, %v1687_v7  ;;  %v1547_v10 = vadd.f32 %v4041_v47, %v1546_v8  ;;  %v2849_v4 = vpop.f32.mrb[127].mxu0 }
 0x3a2   :  { %v1844_v11 = vadd.f32 %v1843_v6, %v1766_v9  ;;  %v1688_v12 = vmul.f32 0.01, %v1547_v10 }
 0x3a3   :  { %v1551_v13 = vpop.f32.mrb[128].mxu0 }
 0x3a4   :  { %v1767_v14 = vmax.f32 %v1547_v10, %v1688_v12  ;;  %v1552_v15 = vadd.f32 %v4041_v47, %v1551_v13  ;;  %v2852_v16 = vpop.f32.mrb[129].mxu0 }
 0x3a6   :  { %v1845_v17 = vadd.f32 %v1844_v11, %v1767_v14  ;;  %v1689_v18 = vmul.f32 0.01, %v1552_v15 }
 0x3a7   :  { %v1556_v19 = vpop.f32.mrb[130].mxu0 }
 0x3a8   :  { %v1768_v20 = vmax.f32 %v1552_v15, %v1689_v18  ;;  %v1557_v21 = vadd.f32 %v4041_v47, %v1556_v19  ;;  %v2855_v22 = vpop.f32.mrb[131].mxu0 }
 0x3aa   :  { %v1846_v23 = vadd.f32 %v1845_v17, %v1768_v20  ;;  %v1690_v24 = vmul.f32 0.01, %v1557_v21 }
 0x3ab   :  { %v1561_v25 = vpop.f32.mrb[132].mxu0 }
 0x3ac   :  { %v1769_v26 = vmax.f32 %v1557_v21, %v1690_v24  ;;  %v1562_v27 = vadd.f32 %v4041_v47, %v1561_v25  ;;  %v2858_v28 = vpop.f32.mrb[133].mxu0 }
 0x3ae   :  { %v1847_v29 = vadd.f32 %v1846_v23, %v1769_v26  ;;  %v1691_v30 = vmul.f32 0.01, %v1562_v27 }
 0x3af   :  { %v1566_v31 = vpop.f32.mrb[134].mxu0 }
 0x3b0   :  { %v1770_v32 = vmax.f32 %v1562_v27, %v1691_v30  ;;  %v1567_v33 = vadd.f32 %v4041_v47, %v1566_v31  ;;  %v2861_v34 = vpop.f32.mrb[135].mxu0 }
 0x3b2   :  { %v1848_v35 = vadd.f32 %v1847_v29, %v1770_v32  ;;  %v1692_v36 = vmul.f32 0.01, %v1567_v33 }
 0x3b3   :  { %v1571_v37 = vpop.f32.mrb[136].mxu0 }
 0x3b4   :  { %v1771_v38 = vmax.f32 %v1567_v33, %v1692_v36  ;;  %v1572_v39 = vadd.f32 %v4041_v47, %v1571_v37  ;;  %v2864_v40 = vpop.f32.mrb[137].mxu0 }
 0x3b6   :  { %v1849_v41 = vadd.f32 %v1848_v35, %v1771_v38  ;;  %v1693_v42 = vmul.f32 0.01, %v1572_v39 }
 0x3b7   :  { %v1576_v43 = vpop.f32.mrb[138].mxu0 }
 0x3b8   :  { %v1772_v2 = vmax.f32 %v1572_v39, %v1693_v42  ;;  %v1577_v44 = vadd.f32 %v4041_v47, %v1576_v43  ;;  %v2867_v45 = vpop.f32.mrb[139].mxu0 }
 0x3ba   :  { %v1850_v46 = vadd.f32 %v1849_v41, %v1772_v2  ;;  %v1694_v48 = vmul.f32 0.01, %v1577_v44 }
 0x3bb   :  { %v1581_v49 = vpop.f32.mrb[140].mxu0 }
 0x3bc   :  { %v1773_v50 = vmax.f32 %v1577_v44, %v1694_v48  ;;  %v1582_v51 = vadd.f32 %v4041_v47, %v1581_v49  ;;  %v2870_v52 = vpop.f32.mrb[141].mxu0  ;;  %v148_v49 = vld [vmem:[%s4108_s6] sm:$0x1]  ;;  %s3083_s6 = smov [#allocation2]  }
 0x3bd   :  { %s2026_s23 = sshll.u32 %s3083_s6, 4  ;;  %s2027_s23 = int_to_ptr.vmem [resolvable:$true] %s2026_s23 }
 0x3be   :  { %v1851_v53 = vadd.f32 %v1850_v46, %v1773_v50  ;;  %v1695_v54 = vmul.f32 0.01, %v1582_v51  ;;  %s3055_s24 = scalar_lea.vmem %s2027_s23, 32  ;;  %p3060_p1 = scmp.lt.s32.totalorder %s2027_s23, %s2027_s23 }
 0x3bf   :  { %v1586_v55 = vpop.f32.mrb[142].mxu0  ;;  %p3056_p0 = scmp.ne.s32.totalorder %s2027_s23, %s3055_s24  ;;  %p3061_p2 = scmp.lt.s32.totalorder %s3055_s24, %s3055_s24 }
 0x3c0   :  { %v1774_v56 = vmax.f32 %v1582_v51, %v1695_v54  ;;  %v1587_v57 = vadd.f32 %v4041_v47, %v1586_v55  ;;  %v2873_v58 = vpop.f32.mrb[143].mxu0  ;;  %v165_v54 = vld [vmem:[%s4110_s8] sm:$0x1] }
 0x3c1   :  { %p3062_p3 = por %p3061_p2, %p3060_p1 }
 0x3c2   :  { %v1852_v59 = vadd.f32 %v1851_v53, %v1774_v56  ;;  %v1696_v60 = vmul.f32 0.01, %v1587_v57 }
 0x3c3   :  { %v1591_v61 = vpop.f32.mrb[144].mxu0  ;;  %p3063_p4 = pnand %p3062_p3, %p3056_p0 }
 0x3c4   :  { %v1775_v62 = vmax.f32 %v1587_v57, %v1696_v60  ;;  %v1592_v63 = vadd.f32 %v4041_v47, %v1591_v61  ;;  %v2876_v0 = vpop.f32.mrb[145].mxu0 }
 0x3c6   :  { %v1853_v1 = vadd.f32 %v1852_v59, %v1775_v62  ;;  %v1697_v3 = vmul.f32 0.01, %v1592_v63 }
 0x3c7   :  { %v1596_v5 = vpop.f32.mrb[146].mxu0 }
 0x3c8   :  { %v1776_v6 = vmax.f32 %v1592_v63, %v1697_v3  ;;  %v1597_v7 = vadd.f32 %v4041_v47, %v1596_v5  ;;  %v2879_v8 = vpop.f32.mrb[147].mxu0 }
 0x3ca   :  { %v1854_v9 = vadd.f32 %v1853_v1, %v1776_v6  ;;  %v1698_v10 = vmul.f32 0.01, %v1597_v7 }
 0x3cb   :  { %v1601_v4 = vpop.f32.mrb[148].mxu0 }
 0x3cc   :  { %v1777_v11 = vmax.f32 %v1597_v7, %v1698_v10  ;;  %v1602_v12 = vadd.f32 %v4041_v47, %v1601_v4  ;;  %v2882_v13 = vpop.f32.mrb[149].mxu0 }
 0x3ce   :  { %v1855_v14 = vadd.f32 %v1854_v9, %v1777_v11  ;;  %v1699_v15 = vmul.f32 0.01, %v1602_v12 }
 0x3cf   :  { %v1606_v16 = vpop.f32.mrb[150].mxu0 }
 0x3d0   :  { %v1778_v17 = vmax.f32 %v1602_v12, %v1699_v15  ;;  %v1607_v18 = vadd.f32 %v4041_v47, %v1606_v16  ;;  %v2885_v19 = vpop.f32.mrb[151].mxu0 }
 0x3d2   :  { %v1856_v20 = vadd.f32 %v1855_v14, %v1778_v17  ;;  %v1700_v21 = vmul.f32 0.01, %v1607_v18 }
 0x3d3   :  { %v1611_v22 = vpop.f32.mrb[152].mxu0 }
 0x3d4   :  { %v1779_v23 = vmax.f32 %v1607_v18, %v1700_v21  ;;  %v1612_v24 = vadd.f32 %v4041_v47, %v1611_v22  ;;  %v2888_v25 = vpop.f32.mrb[153].mxu0 }
 0x3d6   :  { %v1857_v26 = vadd.f32 %v1856_v20, %v1779_v23  ;;  %v1701_v27 = vmul.f32 0.01, %v1612_v24 }
 0x3d7   :  { %v1616_v28 = vpop.f32.mrb[154].mxu0 }
 0x3d8   :  { %v1780_v29 = vmax.f32 %v1612_v24, %v1701_v27  ;;  %v1617_v30 = vadd.f32 %v4041_v47, %v1616_v28  ;;  %v2891_v31 = vpop.f32.mrb[155].mxu0 }
 0x3da   :  { %v1858_v32 = vadd.f32 %v1857_v26, %v1780_v29  ;;  %v1702_v33 = vmul.f32 0.01, %v1617_v30 }
 0x3db   :  { %v1621_v34 = vpop.f32.mrb[156].mxu0 }
 0x3dc   :  { %v1781_v35 = vmax.f32 %v1617_v30, %v1702_v33  ;;  %v1622_v36 = vadd.f32 %v4041_v47, %v1621_v34  ;;  %v2894_v37 = vpop.f32.mrb[157].mxu0 }
 0x3de   :  { %v1859_v38 = vadd.f32 %v1858_v32, %v1781_v35  ;;  %v1703_v39 = vmul.f32 0.01, %v1622_v36 }
 0x3e0   :  { %v1782_v40 = vmax.f32 %v1622_v36, %v1703_v39 }
 0x3e2   :  { %v1861_v41 = vsel %vm1860_vm5, %v1782_v40, 0.0 }
 0x3e3   :  { %v1862_v42 = vadd.f32 %v1861_v41, %v1859_v38 }
 0x3e5   :  { %v1863_v43 = vrot.slane %v1862_v42, 4 }
 0x3e7   :  { %v1864_v2 = vadd.f32 %v1863_v43, %v1862_v42 }
 0x3e9   :  { %v1865_v44 = vrot.slane %v1864_v2, 2 }
 0x3eb   :  { %v1866_v45 = vadd.f32 %v1865_v44, %v1864_v2 }
 0x3ed   :  { %v1867_v46 = vrot.slane %v1866_v45, 1 }
 0x3ef   :  { %v1868_v48 = vadd.f32 %v1867_v46, %v1866_v45 }
 0x3f1   :  { %2928 = vmatmul.mubr.f32.vlgmr.msra.gmra.mrb[172].mxu1 %v1868_v48 }
 0x4c4   :  { %v1935_v50 = vpop.f32.mrb[172].mxu1 }
 0x4c5   :  { %v1936_v47 = vadd.f32 %v1935_v50, %v148_v49  ;;  %v2929_v51 = vpop.f32.mrb[173].mxu1 }
 0x4c7   :  { %v1939_v52 = vmul.f32 0.01, %v1936_v47 }
 0x4c9   :  { %v1940_v53 = vmax.f32 %v1936_v47, %v1939_v52 }
 0x4cb   :  { %2963 = vmatmul.mubr.f32.vlgmr.msra.gmra.mrb[158].mxu0 %v1940_v53 }
 0x59e   :  { %v2007_v55 = vpop.f32.mrb[158].mxu0 }
 0x59f   :  { %v2008_v56 = vadd.f32 %v2007_v55, %v165_v54  ;;  %v2964_v57 = vpop.f32.mrb[159].mxu0 }
 0x5a1   :  { %v2011_v58 = vmul.f32 0.01, %v2008_v56 }
 0x5a3   :  { %v2012_v59 = vmax.f32 %v2008_v56, %v2011_v58 }
 0x5a5   :  { %2016 = vrot.lane.b32.xlu0 %v2012_v59, %s3082_s22  ;;  %2014 = vst.msk [vmem:[#allocation2] sm:$0x1] %vm2013_vm6, %v2012_v59 }
 0x617   :  { %v2017_v60 = vpop.permute.xlu0 %2016 }
 0x618   :  { %2019 = vst.msk [vmem:[#allocation2 + $0x1] sm:$0x1] %vm2013_vm6, %v2017_v60 }
 0x619   :  { %3066 = shalt.err (!%p3063_p4)
}
 0x61a   :  { %s3067_s26 = scalar_lea.hbm %s4111_s9, 32 }
 0x61b   :  { %p3068_p5 = scmp.ne.s32.totalorder %s4111_s9, %s3067_s26  ;;  %p3071_p6 = scmp.lt.u32.totalorder %s3067_s26, %s4111_s9 }
 0x61d   :  { %p3073_p7 = pnand %p3071_p6, %p3068_p5 }
 0x61f   :  { %3076 = shalt.err (!%p3073_p7)
}
 0x620   :  { %2029 = dma.vmem_to_hbm [thread:$0]  %s2027_s23, 32, %s4111_s9, [#allocation3]  }
 0x621   :  { %3077 = dma.done.wait [#allocation3], 32  }
 0x622   :  { %3078 = vsyncadd [#allocation3], 4294967264 }
 0x623   :  { %2033 = vsyncpa [#allocation3], 1 }

</bundles_post_ra>
